<compile_context>
chip_gen: v7x
topology: tpu7x:2x2x1
jax: 0.10.0
libtpu: 0.0.40
codegen_flags: <defaults>
</compile_context>

<pallas_src>
import jax
import jax.numpy as jnp
from jax import lax
from jax.experimental import pallas as pl
from jax.experimental.pallas import tpu as pltpu

# ---------------- config (TEXT_MODELS['lstm'] equivalents) ----------------
VOCAB_SIZE = 50
EMBED_DIM = 32
HIDDEN_DIM = 32
NUM_LAYERS = 2          # kernel below is specialized to 2 layers
BIDIRECTIONAL = True
# dropout -> identity in eval mode

BATCH = 2
SEQ_LEN = 8


# ---------------------------- Pallas kernel --------------------------------
def fused_lstm_kernel(len_ref, gx0_ref, whh0_ref,
                      wih1_ref, whh1_ref, b1_ref,
                      fcw_ref, fcb_ref, out_ref):
    """Fused bidirectional 2-layer LSTM + FC (single invocation, no grid).

    len_ref:  SMEM [B]       int32 sequence lengths (0 for padded batch rows)
    gx0_ref:  VMEM [T*B,8H]  time-major layer-0 input projection (+bias),
                             gate-interleaved, i/f/o columns pre-scaled by 0.5
    whhL_ref: VMEM [2H,8H]   recurrent weights (block structure, _fuse_layer)
    wih1_ref: VMEM [2H,8H]   layer-1 input projection weights
    b1_ref:   VMEM [1,8H]    layer-1 input bias
    fcw_ref:  VMEM [2H,H]    final Linear weight; fcb_ref [1,H] bias
    out_ref:  VMEM [B,H]

    Masked state updates == pack_padded_sequence semantics (no update at
    padded steps): final fwd hidden is the state at t = length-1, final bwd
    hidden is the state at t = 0 (first updated at t = length-1).
    """
    B, H = out_ref.shape
    H2, G8 = 2 * H, 8 * H
    T = gx0_ref.shape[0] // B

    # ---------- hoisted, h-independent setup (never on the serial chain) ----
    # lengths: SMEM scalars -> [B, 2H] int32 matrix.
    len_mat = jnp.concatenate(
        [jnp.full((1, H2), len_ref[b], jnp.int32) for b in range(B)], axis=0)
    col2 = lax.broadcasted_iota(jnp.int32, (1, H2), 1)
    fwd_cols_h = col2 < H                                # [1,2H] fwd state lanes
    col8 = lax.broadcasted_iota(jnp.int32, (1, G8), 1)
    fwd_cols_g = (col8 % (2 * H)) < H                    # [1,8H] fwd gate cols
    # Per-step validity masks on the combined [h_f | h_b] state:
    # fwd lanes valid while t < len, bwd lanes while (T-1-t) < len.
    masks = [len_mat > jnp.where(fwd_cols_h, t, T - 1 - t) for t in range(T)]

    def run_layer(gx, whh):
        """gx: [T*B, 8H] precomputed input projection (+bias), interleaved."""
        # Assemble per-step gx (fwd gate columns from time t, bwd from T-1-t)
        # before the loop -- pure lane-select, not on the recurrent chain.
        gx_steps = [jnp.where(fwd_cols_g,
                              gx[t * B:(t + 1) * B, :],
                              gx[(T - 1 - t) * B:(T - t) * B, :])
                    for t in range(T)]
        h = jnp.zeros((B, H2), jnp.float32)
        c = jnp.zeros((B, H2), jnp.float32)
        hs_f = [None] * T
        hs_b = [None] * T
        for t in range(T):                               # static unroll (T=8)
            gates = jnp.dot(h, whh,
                            preferred_element_type=jnp.float32) + gx_steps[t]
            th = jnp.tanh(gates)                         # single EUP pass
            i_g = 0.5 * th[:, 0 * H2:1 * H2] + 0.5       # == sigmoid(orig i)
            f_g = 0.5 * th[:, 1 * H2:2 * H2] + 0.5       # == sigmoid(orig f)
            g_g = th[:, 2 * H2:3 * H2]                   # tanh(orig g)
            o_g = 0.5 * th[:, 3 * H2:4 * H2] + 0.5       # == sigmoid(orig o)
            c_new = f_g * c + i_g * g_g
            h_new = o_g * jnp.tanh(c_new)
            h = jnp.where(masks[t], h_new, h)
            c = jnp.where(masks[t], c_new, c)
            hs_f[t] = h[:, 0:H]                          # fwd h at time t
            hs_b[T - 1 - t] = h[:, H:H2]                 # bwd h at time T-1-t
        return h, hs_f, hs_b

    # ---- layer 0 (input projection folded into the embedding table) --------
    _, hs_f0, hs_b0 = run_layer(gx0_ref[...], whh0_ref[...])

    # Layer-0 output slab [T*B, 2H], register/value resident (no VMEM scratch).
    slab = jnp.concatenate(
        [jnp.concatenate([hs_f0[t], hs_b0[t]], axis=1) for t in range(T)],
        axis=0)

    # ---- layer 1 ------------------------------------------------------------
    gx1 = jnp.dot(slab, wih1_ref[...],
                  preferred_element_type=jnp.float32) + b1_ref[...]
    h1, _, _ = run_layer(gx1, whh1_ref[...])

    # Final hidden is already [h_f1 | h_b1] in lane order -> FC, in-kernel.
    out_ref[...] = (jnp.dot(h1, fcw_ref[...],
                            preferred_element_type=jnp.float32) + fcb_ref[...])


# ----------------------------- weight fusion ---------------------------------
def _fuse_layer(p):
    """Fuse fwd/bwd weights into gate-interleaved, 0.5-prescaled tensors.

    Gate-column layout (each chunk H wide):
        [ i_f  i_b  f_f  f_b  g_f  g_b  o_f  o_b ]
    i/f/o columns are pre-scaled by 0.5 so the kernel can use the identity
    sigmoid(x) = 0.5 * tanh(x/2) + 0.5 with a single tanh over all gates.

    Returns:
      w_ih [Din, 8H]; w_hh [2H, 8H] (rows 0:H drive fwd gate columns, rows
      H:2H the bwd ones); b [1, 8H].
    """
    H = HIDDEN_DIM

    def interleave(wf, wb):
        chunks = []
        for g in range(4):
            chunks.append(wf[..., g * H:(g + 1) * H])
            chunks.append(wb[..., g * H:(g + 1) * H])
        return jnp.concatenate(chunks, axis=-1)

    w_ih = interleave(p["w_ih_f"], p["w_ih_b"])                  # [Din, 8H]
    b = interleave(p["b_f"], p["b_b"])                           # [1, 8H]
    w_hh = jnp.concatenate(
        [interleave(p["w_hh_f"], jnp.zeros_like(p["w_hh_b"])),   # h_f rows
         interleave(jnp.zeros_like(p["w_hh_f"]), p["w_hh_b"])],  # h_b rows
        axis=0)                                                  # [2H, 8H]

    # 0.5 on i (chunks 0,1), f (2,3), o (6,7); 1.0 on g (4,5).
    scale = jnp.concatenate(
        [jnp.full((1, 4 * H), 0.5, jnp.float32),
         jnp.ones((1, 2 * H), jnp.float32),
         jnp.full((1, 2 * H), 0.5, jnp.float32)], axis=1)
    return w_ih * scale, w_hh * scale, b * scale


# ----------------------------- wrapper ----------------------------------------
@jax.jit
def lstm_text_processor(tokens, lengths, params):
    """tokens: [B, T] int32, lengths: [B] int -> [B, HIDDEN_DIM] float32."""
    assert NUM_LAYERS == 2 and BIDIRECTIONAL
    B, T = tokens.shape
    H = HIDDEN_DIM
    Bp = max(8, -(-B // 8) * 8)          # sublane-aligned batch

    w_ih0, w_hh0, b0 = _fuse_layer(params["lstm"][0])
    w_ih1, w_hh1, b1 = _fuse_layer(params["lstm"][1])

    # Fold embedding @ W_ih0 + b0 into one [VOCAB, 8H] table; the gather
    # replaces both the embedding lookup and the in-kernel layer-0 matmul.
    emb_proj = params["embedding"].astype(jnp.float32) @ w_ih0 + b0

    tok_p = jnp.zeros((Bp, T), tokens.dtype).at[:B].set(tokens)
    len_p = jnp.zeros((Bp,), jnp.int32).at[:B].set(lengths.astype(jnp.int32))

    gx0 = jnp.take(emb_proj, tok_p, axis=0)                       # [Bp, T, 8H]
    gx0 = jnp.transpose(gx0, (1, 0, 2)).reshape(T * Bp, 8 * H)    # time-major

    vmem = pl.BlockSpec(memory_space=pltpu.MemorySpace.VMEM)
    smem = pl.BlockSpec(memory_space=pltpu.MemorySpace.SMEM)

    out = pl.pallas_call(
        fused_lstm_kernel,
        out_shape=jax.ShapeDtypeStruct((Bp, H), jnp.float32),
        in_specs=[smem] + [vmem] * 7,
        out_specs=vmem,
    )(len_p, gx0, w_hh0, w_ih1, w_hh1, b1, params["fc_w"], params["fc_b"])
    return out[:B]


# ------------------------- pure-JAX reference -------------------------------
def _ref_lstm_dir(x_tbd, mask_tb1, w_ih, w_hh, b):
    T, B, _ = x_tbd.shape
    H = w_hh.shape[0]

    def step(carry, inp):
        h, c = carry
        x_t, m = inp
        gates = x_t @ w_ih + h @ w_hh + b
        i_g = jax.nn.sigmoid(gates[:, 0 * H:1 * H])
        f_g = jax.nn.sigmoid(gates[:, 1 * H:2 * H])
        g_g = jnp.tanh(gates[:, 2 * H:3 * H])
        o_g = jax.nn.sigmoid(gates[:, 3 * H:4 * H])
        c_new = f_g * c + i_g * g_g
        h_new = o_g * jnp.tanh(c_new)
        h_out = m * h_new + (1.0 - m) * h
        c_out = m * c_new + (1.0 - m) * c
        return (h_out, c_out), h_out

    init = (jnp.zeros((B, H), jnp.float32), jnp.zeros((B, H), jnp.float32))
    (h_last, _), outs = lax.scan(step, init, (x_tbd, mask_tb1))
    return outs, h_last


def _ref_forward(tokens, lengths, params):
    B, T = tokens.shape
    emb = jnp.take(params["embedding"], tokens, axis=0)
    x = jnp.transpose(emb, (1, 0, 2)).astype(jnp.float32)
    mask = (jnp.arange(T)[None, :] < lengths[:, None]).astype(jnp.float32)
    mask_tb1 = jnp.transpose(mask)[:, :, None]
    layer_in = x
    h_f = h_b = None
    for layer in range(NUM_LAYERS):
        p = params["lstm"][layer]
        out_f, h_f = _ref_lstm_dir(layer_in, mask_tb1,
                                   p["w_ih_f"], p["w_hh_f"], p["b_f"])
        out_b_rev, h_b = _ref_lstm_dir(layer_in[::-1], mask_tb1[::-1],
                                       p["w_ih_b"], p["w_hh_b"], p["b_b"])
        layer_in = jnp.concatenate([out_f, out_b_rev[::-1]], axis=-1)
    hidden = jnp.concatenate([h_f, h_b], axis=-1)
    return hidden @ params["fc_w"] + params["fc_b"]


# ------------------------------ params --------------------------------------
def init_params(key):
    keys = jax.random.split(key, 3 + NUM_LAYERS * 6)
    scale = 0.1
    params = {
        "embedding": scale * jax.random.normal(
            keys[0], (VOCAB_SIZE, EMBED_DIM), jnp.float32),
        "fc_w": scale * jax.random.normal(
            keys[1], (2 * HIDDEN_DIM, HIDDEN_DIM), jnp.float32),
        "fc_b": scale * jax.random.normal(
            keys[2], (1, HIDDEN_DIM), jnp.float32),
        "lstm": [],
    }
    k_idx = 3
    for layer in range(NUM_LAYERS):
        d_in = EMBED_DIM if layer == 0 else 2 * HIDDEN_DIM
        layer_p = {}
        for tag in ("f", "b"):
            layer_p[f"w_ih_{tag}"] = scale * jax.random.normal(
                keys[k_idx], (d_in, 4 * HIDDEN_DIM), jnp.float32)
            layer_p[f"w_hh_{tag}"] = scale * jax.random.normal(
                keys[k_idx + 1], (HIDDEN_DIM, 4 * HIDDEN_DIM), jnp.float32)
            layer_p[f"b_{tag}"] = scale * jax.random.normal(
                keys[k_idx + 2], (1, 4 * HIDDEN_DIM), jnp.float32)
            k_idx += 3
        params["lstm"].append(layer_p)
    return params


# ------------------------------- main ----------------------------------------
if __name__ == "__main__":
    key = jax.random.PRNGKey(0)
    pkey, tkey = jax.random.split(key)
    params = init_params(pkey)

    tokens = jax.random.randint(tkey, (BATCH, SEQ_LEN), 0, VOCAB_SIZE,
                                dtype=jnp.int32)
    lengths = jnp.array([SEQ_LEN, 5], dtype=jnp.int32)

    out = lstm_text_processor(tokens, lengths, params)
    out = jax.block_until_ready(out)

    ref = jax.block_until_ready(_ref_forward(tokens, lengths, params))
    assert out.shape == (BATCH, HIDDEN_DIM)
    assert jnp.allclose(out, ref, rtol=1e-3, atol=1e-3)

    print("KERNEL_OK")
</pallas_src>

<mosaic_0001>
module attributes {stable_mosaic.version = 11 : i64} {
  func.func @fused_lstm_kernel(%arg0: memref<8xi32, #tpu.memory_space<smem>>, %arg1: memref<64x256xf32, #tpu.memory_space<vmem>>, %arg2: memref<64x256xf32, #tpu.memory_space<vmem>>, %arg3: memref<64x256xf32, #tpu.memory_space<vmem>>, %arg4: memref<64x256xf32, #tpu.memory_space<vmem>>, %arg5: memref<1x256xf32, #tpu.memory_space<vmem>>, %arg6: memref<64x32xf32, #tpu.memory_space<vmem>>, %arg7: memref<1x32xf32, #tpu.memory_space<vmem>>, %arg8: memref<8x32xf32, #tpu.memory_space<vmem>>) attributes {dimension_semantics = [], scalar_prefetch = 0 : i64, scratch_operands = 0 : i64, tpu.core_type = #tpu.core_type<tc>} {
    %c0 = arith.constant 0 : index
    %0 = memref.load %arg0[%c0] : memref<8xi32, #tpu.memory_space<smem>>
    %1 = vector.broadcast %0 : i32 to vector<1x64xi32>
    %c1 = arith.constant 1 : index
    %2 = memref.load %arg0[%c1] : memref<8xi32, #tpu.memory_space<smem>>
    %3 = vector.broadcast %2 : i32 to vector<1x64xi32>
    %c2 = arith.constant 2 : index
    %4 = memref.load %arg0[%c2] : memref<8xi32, #tpu.memory_space<smem>>
    %5 = vector.broadcast %4 : i32 to vector<1x64xi32>
    %c3 = arith.constant 3 : index
    %6 = memref.load %arg0[%c3] : memref<8xi32, #tpu.memory_space<smem>>
    %7 = vector.broadcast %6 : i32 to vector<1x64xi32>
    %c4 = arith.constant 4 : index
    %8 = memref.load %arg0[%c4] : memref<8xi32, #tpu.memory_space<smem>>
    %9 = vector.broadcast %8 : i32 to vector<1x64xi32>
    %c5 = arith.constant 5 : index
    %10 = memref.load %arg0[%c5] : memref<8xi32, #tpu.memory_space<smem>>
    %11 = vector.broadcast %10 : i32 to vector<1x64xi32>
    %c6 = arith.constant 6 : index
    %12 = memref.load %arg0[%c6] : memref<8xi32, #tpu.memory_space<smem>>
    %13 = vector.broadcast %12 : i32 to vector<1x64xi32>
    %c7 = arith.constant 7 : index
    %14 = memref.load %arg0[%c7] : memref<8xi32, #tpu.memory_space<smem>>
    %15 = vector.broadcast %14 : i32 to vector<1x64xi32>
    %16 = tpu.concatenate %1, %3, %5, %7, %9, %11, %13, %15 in 0 : vector<1x64xi32>, vector<1x64xi32>, vector<1x64xi32>, vector<1x64xi32>, vector<1x64xi32>, vector<1x64xi32>, vector<1x64xi32>, vector<1x64xi32> -> vector<8x64xi32>
    %17 = tpu.iota {dimensions = array<i32: 1>} : vector<1x64xi32>
    %c32_i32 = arith.constant 32 : i32
    %18 = vector.broadcast %c32_i32 : i32 to vector<1x64xi32>
    %19 = arith.cmpi slt, %17, %18 : vector<1x64xi32>
    %20 = tpu.iota {dimensions = array<i32: 1>} : vector<1x256xi32>
    %c64_i32 = arith.constant 64 : i32
    %c0_i32 = arith.constant 0 : i32
    %21 = arith.cmpi eq, %c64_i32, %c0_i32 : i32
    %c1_i32 = arith.constant 1 : i32
    %22 = arith.select %21, %c1_i32, %c64_i32 : i32
    %23 = vector.broadcast %22 : i32 to vector<1x256xi32>
    %24 = arith.remsi %20, %23 : vector<1x256xi32>
    %c0_i32_0 = arith.constant 0 : i32
    %25 = vector.broadcast %c0_i32_0 : i32 to vector<1x256xi32>
    %26 = arith.cmpi ne, %24, %25 : vector<1x256xi32>
    %c0_i32_1 = arith.constant 0 : i32
    %27 = vector.broadcast %c0_i32_1 : i32 to vector<1x256xi32>
    %28 = arith.cmpi slt, %24, %27 : vector<1x256xi32>
    %c0_i32_2 = arith.constant 0 : i32
    %29 = arith.cmpi slt, %22, %c0_i32_2 : i32
    %30 = vector.broadcast %29 : i1 to vector<1x256xi1>
    %31 = vector.broadcast %30 : vector<1x256xi1> to vector<1x256xi1>
    %32 = arith.xori %28, %31 : vector<1x256xi1>
    %33 = arith.andi %32, %26 : vector<1x256xi1>
    %34 = vector.broadcast %22 : i32 to vector<1x256xi32>
    %35 = arith.addi %24, %34 : vector<1x256xi32>
    %36 = arith.select %33, %35, %24 : vector<1x256xi1>, vector<1x256xi32>
    %c32_i32_3 = arith.constant 32 : i32
    %37 = vector.broadcast %c32_i32_3 : i32 to vector<1x256xi32>
    %38 = arith.cmpi slt, %36, %37 : vector<1x256xi32>
    %c0_i32_4 = arith.constant 0 : i32
    %c7_i32 = arith.constant 7 : i32
    %39 = vector.broadcast %c0_i32_4 : i32 to vector<1x64xi32>
    %40 = vector.broadcast %c7_i32 : i32 to vector<1x64xi32>
    %41 = arith.select %19, %39, %40 : vector<1x64xi1>, vector<1x64xi32>
    %42 = vector.broadcast %41 : vector<1x64xi32> to vector<8x64xi32>
    %43 = arith.cmpi sgt, %16, %42 : vector<8x64xi32>
    %c1_i32_5 = arith.constant 1 : i32
    %c6_i32 = arith.constant 6 : i32
    %44 = vector.broadcast %c1_i32_5 : i32 to vector<1x64xi32>
    %45 = vector.broadcast %c6_i32 : i32 to vector<1x64xi32>
    %46 = arith.select %19, %44, %45 : vector<1x64xi1>, vector<1x64xi32>
    %47 = vector.broadcast %46 : vector<1x64xi32> to vector<8x64xi32>
    %48 = arith.cmpi sgt, %16, %47 : vector<8x64xi32>
    %c2_i32 = arith.constant 2 : i32
    %c5_i32 = arith.constant 5 : i32
    %49 = vector.broadcast %c2_i32 : i32 to vector<1x64xi32>
    %50 = vector.broadcast %c5_i32 : i32 to vector<1x64xi32>
    %51 = arith.select %19, %49, %50 : vector<1x64xi1>, vector<1x64xi32>
    %52 = vector.broadcast %51 : vector<1x64xi32> to vector<8x64xi32>
    %53 = arith.cmpi sgt, %16, %52 : vector<8x64xi32>
    %c3_i32 = arith.constant 3 : i32
    %c4_i32 = arith.constant 4 : i32
    %54 = vector.broadcast %c3_i32 : i32 to vector<1x64xi32>
    %55 = vector.broadcast %c4_i32 : i32 to vector<1x64xi32>
    %56 = arith.select %19, %54, %55 : vector<1x64xi1>, vector<1x64xi32>
    %57 = vector.broadcast %56 : vector<1x64xi32> to vector<8x64xi32>
    %58 = arith.cmpi sgt, %16, %57 : vector<8x64xi32>
    %c4_i32_6 = arith.constant 4 : i32
    %c3_i32_7 = arith.constant 3 : i32
    %59 = vector.broadcast %c4_i32_6 : i32 to vector<1x64xi32>
    %60 = vector.broadcast %c3_i32_7 : i32 to vector<1x64xi32>
    %61 = arith.select %19, %59, %60 : vector<1x64xi1>, vector<1x64xi32>
    %62 = vector.broadcast %61 : vector<1x64xi32> to vector<8x64xi32>
    %63 = arith.cmpi sgt, %16, %62 : vector<8x64xi32>
    %c5_i32_8 = arith.constant 5 : i32
    %c2_i32_9 = arith.constant 2 : i32
    %64 = vector.broadcast %c5_i32_8 : i32 to vector<1x64xi32>
    %65 = vector.broadcast %c2_i32_9 : i32 to vector<1x64xi32>
    %66 = arith.select %19, %64, %65 : vector<1x64xi1>, vector<1x64xi32>
    %67 = vector.broadcast %66 : vector<1x64xi32> to vector<8x64xi32>
    %68 = arith.cmpi sgt, %16, %67 : vector<8x64xi32>
    %c6_i32_10 = arith.constant 6 : i32
    %c1_i32_11 = arith.constant 1 : i32
    %69 = vector.broadcast %c6_i32_10 : i32 to vector<1x64xi32>
    %70 = vector.broadcast %c1_i32_11 : i32 to vector<1x64xi32>
    %71 = arith.select %19, %69, %70 : vector<1x64xi1>, vector<1x64xi32>
    %72 = vector.broadcast %71 : vector<1x64xi32> to vector<8x64xi32>
    %73 = arith.cmpi sgt, %16, %72 : vector<8x64xi32>
    %c7_i32_12 = arith.constant 7 : i32
    %c0_i32_13 = arith.constant 0 : i32
    %74 = vector.broadcast %c7_i32_12 : i32 to vector<1x64xi32>
    %75 = vector.broadcast %c0_i32_13 : i32 to vector<1x64xi32>
    %76 = arith.select %19, %74, %75 : vector<1x64xi1>, vector<1x64xi32>
    %77 = vector.broadcast %76 : vector<1x64xi32> to vector<8x64xi32>
    %78 = arith.cmpi sgt, %16, %77 : vector<8x64xi32>
    %c0_14 = arith.constant 0 : index
    %c0_15 = arith.constant 0 : index
    %79 = vector.load %arg1[%c0_14, %c0_15] : memref<64x256xf32, #tpu.memory_space<vmem>>, vector<64x256xf32>
    %c0_16 = arith.constant 0 : index
    %c0_17 = arith.constant 0 : index
    %80 = vector.load %arg2[%c0_16, %c0_17] : memref<64x256xf32, #tpu.memory_space<vmem>>, vector<64x256xf32>
    %81 = vector.extract_strided_slice %79 {offsets = [0, 0], sizes = [8, 256], strides = [1, 1]} : vector<64x256xf32> to vector<8x256xf32>
    %82 = vector.extract_strided_slice %79 {offsets = [56, 0], sizes = [8, 256], strides = [1, 1]} : vector<64x256xf32> to vector<8x256xf32>
    %83 = vector.shape_cast %38 : vector<1x256xi1> to vector<1x256xi1>
    %84 = vector.broadcast %83 : vector<1x256xi1> to vector<8x256xi1>
    %85 = arith.select %84, %81, %82 : vector<8x256xi1>, vector<8x256xf32>
    %86 = vector.extract_strided_slice %79 {offsets = [8, 0], sizes = [8, 256], strides = [1, 1]} : vector<64x256xf32> to vector<8x256xf32>
    %87 = vector.extract_strided_slice %79 {offsets = [48, 0], sizes = [8, 256], strides = [1, 1]} : vector<64x256xf32> to vector<8x256xf32>
    %88 = vector.shape_cast %38 : vector<1x256xi1> to vector<1x256xi1>
    %89 = vector.broadcast %88 : vector<1x256xi1> to vector<8x256xi1>
    %90 = arith.select %89, %86, %87 : vector<8x256xi1>, vector<8x256xf32>
    %91 = vector.extract_strided_slice %79 {offsets = [16, 0], sizes = [8, 256], strides = [1, 1]} : vector<64x256xf32> to vector<8x256xf32>
    %92 = vector.extract_strided_slice %79 {offsets = [40, 0], sizes = [8, 256], strides = [1, 1]} : vector<64x256xf32> to vector<8x256xf32>
    %93 = vector.shape_cast %38 : vector<1x256xi1> to vector<1x256xi1>
    %94 = vector.broadcast %93 : vector<1x256xi1> to vector<8x256xi1>
    %95 = arith.select %94, %91, %92 : vector<8x256xi1>, vector<8x256xf32>
    %96 = vector.extract_strided_slice %79 {offsets = [24, 0], sizes = [8, 256], strides = [1, 1]} : vector<64x256xf32> to vector<8x256xf32>
    %97 = vector.extract_strided_slice %79 {offsets = [32, 0], sizes = [8, 256], strides = [1, 1]} : vector<64x256xf32> to vector<8x256xf32>
    %98 = vector.shape_cast %38 : vector<1x256xi1> to vector<1x256xi1>
    %99 = vector.broadcast %98 : vector<1x256xi1> to vector<8x256xi1>
    %100 = arith.select %99, %96, %97 : vector<8x256xi1>, vector<8x256xf32>
    %101 = vector.extract_strided_slice %79 {offsets = [32, 0], sizes = [8, 256], strides = [1, 1]} : vector<64x256xf32> to vector<8x256xf32>
    %102 = vector.extract_strided_slice %79 {offsets = [24, 0], sizes = [8, 256], strides = [1, 1]} : vector<64x256xf32> to vector<8x256xf32>
    %103 = vector.shape_cast %38 : vector<1x256xi1> to vector<1x256xi1>
    %104 = vector.broadcast %103 : vector<1x256xi1> to vector<8x256xi1>
    %105 = arith.select %104, %101, %102 : vector<8x256xi1>, vector<8x256xf32>
    %106 = vector.extract_strided_slice %79 {offsets = [40, 0], sizes = [8, 256], strides = [1, 1]} : vector<64x256xf32> to vector<8x256xf32>
    %107 = vector.extract_strided_slice %79 {offsets = [16, 0], sizes = [8, 256], strides = [1, 1]} : vector<64x256xf32> to vector<8x256xf32>
    %108 = vector.shape_cast %38 : vector<1x256xi1> to vector<1x256xi1>
    %109 = vector.broadcast %108 : vector<1x256xi1> to vector<8x256xi1>
    %110 = arith.select %109, %106, %107 : vector<8x256xi1>, vector<8x256xf32>
    %111 = vector.extract_strided_slice %79 {offsets = [48, 0], sizes = [8, 256], strides = [1, 1]} : vector<64x256xf32> to vector<8x256xf32>
    %112 = vector.extract_strided_slice %79 {offsets = [8, 0], sizes = [8, 256], strides = [1, 1]} : vector<64x256xf32> to vector<8x256xf32>
    %113 = vector.shape_cast %38 : vector<1x256xi1> to vector<1x256xi1>
    %114 = vector.broadcast %113 : vector<1x256xi1> to vector<8x256xi1>
    %115 = arith.select %114, %111, %112 : vector<8x256xi1>, vector<8x256xf32>
    %116 = vector.extract_strided_slice %79 {offsets = [56, 0], sizes = [8, 256], strides = [1, 1]} : vector<64x256xf32> to vector<8x256xf32>
    %117 = vector.extract_strided_slice %79 {offsets = [0, 0], sizes = [8, 256], strides = [1, 1]} : vector<64x256xf32> to vector<8x256xf32>
    %118 = vector.shape_cast %38 : vector<1x256xi1> to vector<1x256xi1>
    %119 = vector.broadcast %118 : vector<1x256xi1> to vector<8x256xi1>
    %120 = arith.select %119, %116, %117 : vector<8x256xi1>, vector<8x256xf32>
    %cst = arith.constant 0.000000e+00 : f32
    %121 = vector.broadcast %cst : f32 to vector<8x64xf32>
    %cst_18 = arith.constant 0.000000e+00 : f32
    %122 = vector.broadcast %cst_18 : f32 to vector<8x64xf32>
    %cst_19 = arith.constant dense<0.000000e+00> : vector<8x256xf32>
    %123 = tpu.matmul %121, %80, %cst_19 {dimension_numbers = #tpu.dot_dimension_numbers<[1], [0], [0], [1], [0, 0, 1, 1], [], []>} : vector<8x64xf32>, vector<64x256xf32>, vector<8x256xf32> -> vector<8x256xf32>
    %124 = arith.addf %123, %85 : vector<8x256xf32>
    %125 = math.tanh %124 : vector<8x256xf32>
    %126 = vector.extract_strided_slice %125 {offsets = [0, 0], sizes = [8, 64], strides = [1, 1]} : vector<8x256xf32> to vector<8x64xf32>
    %cst_20 = arith.constant 5.000000e-01 : f32
    %127 = vector.broadcast %cst_20 : f32 to vector<8x64xf32>
    %128 = arith.mulf %127, %126 : vector<8x64xf32>
    %cst_21 = arith.constant 5.000000e-01 : f32
    %129 = vector.broadcast %cst_21 : f32 to vector<8x64xf32>
    %130 = arith.addf %128, %129 : vector<8x64xf32>
    %131 = vector.extract_strided_slice %125 {offsets = [0, 64], sizes = [8, 64], strides = [1, 1]} : vector<8x256xf32> to vector<8x64xf32>
    %cst_22 = arith.constant 5.000000e-01 : f32
    %132 = vector.broadcast %cst_22 : f32 to vector<8x64xf32>
    %133 = arith.mulf %132, %131 : vector<8x64xf32>
    %cst_23 = arith.constant 5.000000e-01 : f32
    %134 = vector.broadcast %cst_23 : f32 to vector<8x64xf32>
    %135 = arith.addf %133, %134 : vector<8x64xf32>
    %136 = vector.extract_strided_slice %125 {offsets = [0, 128], sizes = [8, 64], strides = [1, 1]} : vector<8x256xf32> to vector<8x64xf32>
    %137 = vector.extract_strided_slice %125 {offsets = [0, 192], sizes = [8, 64], strides = [1, 1]} : vector<8x256xf32> to vector<8x64xf32>
    %cst_24 = arith.constant 5.000000e-01 : f32
    %138 = vector.broadcast %cst_24 : f32 to vector<8x64xf32>
    %139 = arith.mulf %138, %137 : vector<8x64xf32>
    %cst_25 = arith.constant 5.000000e-01 : f32
    %140 = vector.broadcast %cst_25 : f32 to vector<8x64xf32>
    %141 = arith.addf %139, %140 : vector<8x64xf32>
    %142 = arith.mulf %135, %122 : vector<8x64xf32>
    %143 = arith.mulf %130, %136 : vector<8x64xf32>
    %144 = arith.addf %142, %143 : vector<8x64xf32>
    %145 = math.tanh %144 : vector<8x64xf32>
    %146 = arith.mulf %141, %145 : vector<8x64xf32>
    %147 = arith.select %43, %146, %121 : vector<8x64xi1>, vector<8x64xf32>
    %148 = arith.select %43, %144, %122 : vector<8x64xi1>, vector<8x64xf32>
    %149 = vector.extract_strided_slice %147 {offsets = [0, 0], sizes = [8, 32], strides = [1, 1]} : vector<8x64xf32> to vector<8x32xf32>
    %150 = vector.extract_strided_slice %147 {offsets = [0, 32], sizes = [8, 32], strides = [1, 1]} : vector<8x64xf32> to vector<8x32xf32>
    %cst_26 = arith.constant dense<0.000000e+00> : vector<8x256xf32>
    %151 = tpu.matmul %147, %80, %cst_26 {dimension_numbers = #tpu.dot_dimension_numbers<[1], [0], [0], [1], [0, 0, 1, 1], [], []>} : vector<8x64xf32>, vector<64x256xf32>, vector<8x256xf32> -> vector<8x256xf32>
    %152 = arith.addf %151, %90 : vector<8x256xf32>
    %153 = math.tanh %152 : vector<8x256xf32>
    %154 = vector.extract_strided_slice %153 {offsets = [0, 0], sizes = [8, 64], strides = [1, 1]} : vector<8x256xf32> to vector<8x64xf32>
    %cst_27 = arith.constant 5.000000e-01 : f32
    %155 = vector.broadcast %cst_27 : f32 to vector<8x64xf32>
    %156 = arith.mulf %155, %154 : vector<8x64xf32>
    %cst_28 = arith.constant 5.000000e-01 : f32
    %157 = vector.broadcast %cst_28 : f32 to vector<8x64xf32>
    %158 = arith.addf %156, %157 : vector<8x64xf32>
    %159 = vector.extract_strided_slice %153 {offsets = [0, 64], sizes = [8, 64], strides = [1, 1]} : vector<8x256xf32> to vector<8x64xf32>
    %cst_29 = arith.constant 5.000000e-01 : f32
    %160 = vector.broadcast %cst_29 : f32 to vector<8x64xf32>
    %161 = arith.mulf %160, %159 : vector<8x64xf32>
    %cst_30 = arith.constant 5.000000e-01 : f32
    %162 = vector.broadcast %cst_30 : f32 to vector<8x64xf32>
    %163 = arith.addf %161, %162 : vector<8x64xf32>
    %164 = vector.extract_strided_slice %153 {offsets = [0, 128], sizes = [8, 64], strides = [1, 1]} : vector<8x256xf32> to vector<8x64xf32>
    %165 = vector.extract_strided_slice %153 {offsets = [0, 192], sizes = [8, 64], strides = [1, 1]} : vector<8x256xf32> to vector<8x64xf32>
    %cst_31 = arith.constant 5.000000e-01 : f32
    %166 = vector.broadcast %cst_31 : f32 to vector<8x64xf32>
    %167 = arith.mulf %166, %165 : vector<8x64xf32>
    %cst_32 = arith.constant 5.000000e-01 : f32
    %168 = vector.broadcast %cst_32 : f32 to vector<8x64xf32>
    %169 = arith.addf %167, %168 : vector<8x64xf32>
    %170 = arith.mulf %163, %148 : vector<8x64xf32>
    %171 = arith.mulf %158, %164 : vector<8x64xf32>
    %172 = arith.addf %170, %171 : vector<8x64xf32>
    %173 = math.tanh %172 : vector<8x64xf32>
    %174 = arith.mulf %169, %173 : vector<8x64xf32>
    %175 = arith.select %48, %174, %147 : vector<8x64xi1>, vector<8x64xf32>
    %176 = arith.select %48, %172, %148 : vector<8x64xi1>, vector<8x64xf32>
    %177 = vector.extract_strided_slice %175 {offsets = [0, 0], sizes = [8, 32], strides = [1, 1]} : vector<8x64xf32> to vector<8x32xf32>
    %178 = vector.extract_strided_slice %175 {offsets = [0, 32], sizes = [8, 32], strides = [1, 1]} : vector<8x64xf32> to vector<8x32xf32>
    %cst_33 = arith.constant dense<0.000000e+00> : vector<8x256xf32>
    %179 = tpu.matmul %175, %80, %cst_33 {dimension_numbers = #tpu.dot_dimension_numbers<[1], [0], [0], [1], [0, 0, 1, 1], [], []>} : vector<8x64xf32>, vector<64x256xf32>, vector<8x256xf32> -> vector<8x256xf32>
    %180 = arith.addf %179, %95 : vector<8x256xf32>
    %181 = math.tanh %180 : vector<8x256xf32>
    %182 = vector.extract_strided_slice %181 {offsets = [0, 0], sizes = [8, 64], strides = [1, 1]} : vector<8x256xf32> to vector<8x64xf32>
    %cst_34 = arith.constant 5.000000e-01 : f32
    %183 = vector.broadcast %cst_34 : f32 to vector<8x64xf32>
    %184 = arith.mulf %183, %182 : vector<8x64xf32>
    %cst_35 = arith.constant 5.000000e-01 : f32
    %185 = vector.broadcast %cst_35 : f32 to vector<8x64xf32>
    %186 = arith.addf %184, %185 : vector<8x64xf32>
    %187 = vector.extract_strided_slice %181 {offsets = [0, 64], sizes = [8, 64], strides = [1, 1]} : vector<8x256xf32> to vector<8x64xf32>
    %cst_36 = arith.constant 5.000000e-01 : f32
    %188 = vector.broadcast %cst_36 : f32 to vector<8x64xf32>
    %189 = arith.mulf %188, %187 : vector<8x64xf32>
    %cst_37 = arith.constant 5.000000e-01 : f32
    %190 = vector.broadcast %cst_37 : f32 to vector<8x64xf32>
    %191 = arith.addf %189, %190 : vector<8x64xf32>
    %192 = vector.extract_strided_slice %181 {offsets = [0, 128], sizes = [8, 64], strides = [1, 1]} : vector<8x256xf32> to vector<8x64xf32>
    %193 = vector.extract_strided_slice %181 {offsets = [0, 192], sizes = [8, 64], strides = [1, 1]} : vector<8x256xf32> to vector<8x64xf32>
    %cst_38 = arith.constant 5.000000e-01 : f32
    %194 = vector.broadcast %cst_38 : f32 to vector<8x64xf32>
    %195 = arith.mulf %194, %193 : vector<8x64xf32>
    %cst_39 = arith.constant 5.000000e-01 : f32
    %196 = vector.broadcast %cst_39 : f32 to vector<8x64xf32>
    %197 = arith.addf %195, %196 : vector<8x64xf32>
    %198 = arith.mulf %191, %176 : vector<8x64xf32>
    %199 = arith.mulf %186, %192 : vector<8x64xf32>
    %200 = arith.addf %198, %199 : vector<8x64xf32>
    %201 = math.tanh %200 : vector<8x64xf32>
    %202 = arith.mulf %197, %201 : vector<8x64xf32>
    %203 = arith.select %53, %202, %175 : vector<8x64xi1>, vector<8x64xf32>
    %204 = arith.select %53, %200, %176 : vector<8x64xi1>, vector<8x64xf32>
    %205 = vector.extract_strided_slice %203 {offsets = [0, 0], sizes = [8, 32], strides = [1, 1]} : vector<8x64xf32> to vector<8x32xf32>
    %206 = vector.extract_strided_slice %203 {offsets = [0, 32], sizes = [8, 32], strides = [1, 1]} : vector<8x64xf32> to vector<8x32xf32>
    %cst_40 = arith.constant dense<0.000000e+00> : vector<8x256xf32>
    %207 = tpu.matmul %203, %80, %cst_40 {dimension_numbers = #tpu.dot_dimension_numbers<[1], [0], [0], [1], [0, 0, 1, 1], [], []>} : vector<8x64xf32>, vector<64x256xf32>, vector<8x256xf32> -> vector<8x256xf32>
    %208 = arith.addf %207, %100 : vector<8x256xf32>
    %209 = math.tanh %208 : vector<8x256xf32>
    %210 = vector.extract_strided_slice %209 {offsets = [0, 0], sizes = [8, 64], strides = [1, 1]} : vector<8x256xf32> to vector<8x64xf32>
    %cst_41 = arith.constant 5.000000e-01 : f32
    %211 = vector.broadcast %cst_41 : f32 to vector<8x64xf32>
    %212 = arith.mulf %211, %210 : vector<8x64xf32>
    %cst_42 = arith.constant 5.000000e-01 : f32
    %213 = vector.broadcast %cst_42 : f32 to vector<8x64xf32>
    %214 = arith.addf %212, %213 : vector<8x64xf32>
    %215 = vector.extract_strided_slice %209 {offsets = [0, 64], sizes = [8, 64], strides = [1, 1]} : vector<8x256xf32> to vector<8x64xf32>
    %cst_43 = arith.constant 5.000000e-01 : f32
    %216 = vector.broadcast %cst_43 : f32 to vector<8x64xf32>
    %217 = arith.mulf %216, %215 : vector<8x64xf32>
    %cst_44 = arith.constant 5.000000e-01 : f32
    %218 = vector.broadcast %cst_44 : f32 to vector<8x64xf32>
    %219 = arith.addf %217, %218 : vector<8x64xf32>
    %220 = vector.extract_strided_slice %209 {offsets = [0, 128], sizes = [8, 64], strides = [1, 1]} : vector<8x256xf32> to vector<8x64xf32>
    %221 = vector.extract_strided_slice %209 {offsets = [0, 192], sizes = [8, 64], strides = [1, 1]} : vector<8x256xf32> to vector<8x64xf32>
    %cst_45 = arith.constant 5.000000e-01 : f32
    %222 = vector.broadcast %cst_45 : f32 to vector<8x64xf32>
    %223 = arith.mulf %222, %221 : vector<8x64xf32>
    %cst_46 = arith.constant 5.000000e-01 : f32
    %224 = vector.broadcast %cst_46 : f32 to vector<8x64xf32>
    %225 = arith.addf %223, %224 : vector<8x64xf32>
    %226 = arith.mulf %219, %204 : vector<8x64xf32>
    %227 = arith.mulf %214, %220 : vector<8x64xf32>
    %228 = arith.addf %226, %227 : vector<8x64xf32>
    %229 = math.tanh %228 : vector<8x64xf32>
    %230 = arith.mulf %225, %229 : vector<8x64xf32>
    %231 = arith.select %58, %230, %203 : vector<8x64xi1>, vector<8x64xf32>
    %232 = arith.select %58, %228, %204 : vector<8x64xi1>, vector<8x64xf32>
    %233 = vector.extract_strided_slice %231 {offsets = [0, 0], sizes = [8, 32], strides = [1, 1]} : vector<8x64xf32> to vector<8x32xf32>
    %234 = vector.extract_strided_slice %231 {offsets = [0, 32], sizes = [8, 32], strides = [1, 1]} : vector<8x64xf32> to vector<8x32xf32>
    %cst_47 = arith.constant dense<0.000000e+00> : vector<8x256xf32>
    %235 = tpu.matmul %231, %80, %cst_47 {dimension_numbers = #tpu.dot_dimension_numbers<[1], [0], [0], [1], [0, 0, 1, 1], [], []>} : vector<8x64xf32>, vector<64x256xf32>, vector<8x256xf32> -> vector<8x256xf32>
    %236 = arith.addf %235, %105 : vector<8x256xf32>
    %237 = math.tanh %236 : vector<8x256xf32>
    %238 = vector.extract_strided_slice %237 {offsets = [0, 0], sizes = [8, 64], strides = [1, 1]} : vector<8x256xf32> to vector<8x64xf32>
    %cst_48 = arith.constant 5.000000e-01 : f32
    %239 = vector.broadcast %cst_48 : f32 to vector<8x64xf32>
    %240 = arith.mulf %239, %238 : vector<8x64xf32>
    %cst_49 = arith.constant 5.000000e-01 : f32
    %241 = vector.broadcast %cst_49 : f32 to vector<8x64xf32>
    %242 = arith.addf %240, %241 : vector<8x64xf32>
    %243 = vector.extract_strided_slice %237 {offsets = [0, 64], sizes = [8, 64], strides = [1, 1]} : vector<8x256xf32> to vector<8x64xf32>
    %cst_50 = arith.constant 5.000000e-01 : f32
    %244 = vector.broadcast %cst_50 : f32 to vector<8x64xf32>
    %245 = arith.mulf %244, %243 : vector<8x64xf32>
    %cst_51 = arith.constant 5.000000e-01 : f32
    %246 = vector.broadcast %cst_51 : f32 to vector<8x64xf32>
    %247 = arith.addf %245, %246 : vector<8x64xf32>
    %248 = vector.extract_strided_slice %237 {offsets = [0, 128], sizes = [8, 64], strides = [1, 1]} : vector<8x256xf32> to vector<8x64xf32>
    %249 = vector.extract_strided_slice %237 {offsets = [0, 192], sizes = [8, 64], strides = [1, 1]} : vector<8x256xf32> to vector<8x64xf32>
    %cst_52 = arith.constant 5.000000e-01 : f32
    %250 = vector.broadcast %cst_52 : f32 to vector<8x64xf32>
    %251 = arith.mulf %250, %249 : vector<8x64xf32>
    %cst_53 = arith.constant 5.000000e-01 : f32
    %252 = vector.broadcast %cst_53 : f32 to vector<8x64xf32>
    %253 = arith.addf %251, %252 : vector<8x64xf32>
    %254 = arith.mulf %247, %232 : vector<8x64xf32>
    %255 = arith.mulf %242, %248 : vector<8x64xf32>
    %256 = arith.addf %254, %255 : vector<8x64xf32>
    %257 = math.tanh %256 : vector<8x64xf32>
    %258 = arith.mulf %253, %257 : vector<8x64xf32>
    %259 = arith.select %63, %258, %231 : vector<8x64xi1>, vector<8x64xf32>
    %260 = arith.select %63, %256, %232 : vector<8x64xi1>, vector<8x64xf32>
    %261 = vector.extract_strided_slice %259 {offsets = [0, 0], sizes = [8, 32], strides = [1, 1]} : vector<8x64xf32> to vector<8x32xf32>
    %262 = vector.extract_strided_slice %259 {offsets = [0, 32], sizes = [8, 32], strides = [1, 1]} : vector<8x64xf32> to vector<8x32xf32>
    %cst_54 = arith.constant dense<0.000000e+00> : vector<8x256xf32>
    %263 = tpu.matmul %259, %80, %cst_54 {dimension_numbers = #tpu.dot_dimension_numbers<[1], [0], [0], [1], [0, 0, 1, 1], [], []>} : vector<8x64xf32>, vector<64x256xf32>, vector<8x256xf32> -> vector<8x256xf32>
    %264 = arith.addf %263, %110 : vector<8x256xf32>
    %265 = math.tanh %264 : vector<8x256xf32>
    %266 = vector.extract_strided_slice %265 {offsets = [0, 0], sizes = [8, 64], strides = [1, 1]} : vector<8x256xf32> to vector<8x64xf32>
    %cst_55 = arith.constant 5.000000e-01 : f32
    %267 = vector.broadcast %cst_55 : f32 to vector<8x64xf32>
    %268 = arith.mulf %267, %266 : vector<8x64xf32>
    %cst_56 = arith.constant 5.000000e-01 : f32
    %269 = vector.broadcast %cst_56 : f32 to vector<8x64xf32>
    %270 = arith.addf %268, %269 : vector<8x64xf32>
    %271 = vector.extract_strided_slice %265 {offsets = [0, 64], sizes = [8, 64], strides = [1, 1]} : vector<8x256xf32> to vector<8x64xf32>
    %cst_57 = arith.constant 5.000000e-01 : f32
    %272 = vector.broadcast %cst_57 : f32 to vector<8x64xf32>
    %273 = arith.mulf %272, %271 : vector<8x64xf32>
    %cst_58 = arith.constant 5.000000e-01 : f32
    %274 = vector.broadcast %cst_58 : f32 to vector<8x64xf32>
    %275 = arith.addf %273, %274 : vector<8x64xf32>
    %276 = vector.extract_strided_slice %265 {offsets = [0, 128], sizes = [8, 64], strides = [1, 1]} : vector<8x256xf32> to vector<8x64xf32>
    %277 = vector.extract_strided_slice %265 {offsets = [0, 192], sizes = [8, 64], strides = [1, 1]} : vector<8x256xf32> to vector<8x64xf32>
    %cst_59 = arith.constant 5.000000e-01 : f32
    %278 = vector.broadcast %cst_59 : f32 to vector<8x64xf32>
    %279 = arith.mulf %278, %277 : vector<8x64xf32>
    %cst_60 = arith.constant 5.000000e-01 : f32
    %280 = vector.broadcast %cst_60 : f32 to vector<8x64xf32>
    %281 = arith.addf %279, %280 : vector<8x64xf32>
    %282 = arith.mulf %275, %260 : vector<8x64xf32>
    %283 = arith.mulf %270, %276 : vector<8x64xf32>
    %284 = arith.addf %282, %283 : vector<8x64xf32>
    %285 = math.tanh %284 : vector<8x64xf32>
    %286 = arith.mulf %281, %285 : vector<8x64xf32>
    %287 = arith.select %68, %286, %259 : vector<8x64xi1>, vector<8x64xf32>
    %288 = arith.select %68, %284, %260 : vector<8x64xi1>, vector<8x64xf32>
    %289 = vector.extract_strided_slice %287 {offsets = [0, 0], sizes = [8, 32], strides = [1, 1]} : vector<8x64xf32> to vector<8x32xf32>
    %290 = vector.extract_strided_slice %287 {offsets = [0, 32], sizes = [8, 32], strides = [1, 1]} : vector<8x64xf32> to vector<8x32xf32>
    %cst_61 = arith.constant dense<0.000000e+00> : vector<8x256xf32>
    %291 = tpu.matmul %287, %80, %cst_61 {dimension_numbers = #tpu.dot_dimension_numbers<[1], [0], [0], [1], [0, 0, 1, 1], [], []>} : vector<8x64xf32>, vector<64x256xf32>, vector<8x256xf32> -> vector<8x256xf32>
    %292 = arith.addf %291, %115 : vector<8x256xf32>
    %293 = math.tanh %292 : vector<8x256xf32>
    %294 = vector.extract_strided_slice %293 {offsets = [0, 0], sizes = [8, 64], strides = [1, 1]} : vector<8x256xf32> to vector<8x64xf32>
    %cst_62 = arith.constant 5.000000e-01 : f32
    %295 = vector.broadcast %cst_62 : f32 to vector<8x64xf32>
    %296 = arith.mulf %295, %294 : vector<8x64xf32>
    %cst_63 = arith.constant 5.000000e-01 : f32
    %297 = vector.broadcast %cst_63 : f32 to vector<8x64xf32>
    %298 = arith.addf %296, %297 : vector<8x64xf32>
    %299 = vector.extract_strided_slice %293 {offsets = [0, 64], sizes = [8, 64], strides = [1, 1]} : vector<8x256xf32> to vector<8x64xf32>
    %cst_64 = arith.constant 5.000000e-01 : f32
    %300 = vector.broadcast %cst_64 : f32 to vector<8x64xf32>
    %301 = arith.mulf %300, %299 : vector<8x64xf32>
    %cst_65 = arith.constant 5.000000e-01 : f32
    %302 = vector.broadcast %cst_65 : f32 to vector<8x64xf32>
    %303 = arith.addf %301, %302 : vector<8x64xf32>
    %304 = vector.extract_strided_slice %293 {offsets = [0, 128], sizes = [8, 64], strides = [1, 1]} : vector<8x256xf32> to vector<8x64xf32>
    %305 = vector.extract_strided_slice %293 {offsets = [0, 192], sizes = [8, 64], strides = [1, 1]} : vector<8x256xf32> to vector<8x64xf32>
    %cst_66 = arith.constant 5.000000e-01 : f32
    %306 = vector.broadcast %cst_66 : f32 to vector<8x64xf32>
    %307 = arith.mulf %306, %305 : vector<8x64xf32>
    %cst_67 = arith.constant 5.000000e-01 : f32
    %308 = vector.broadcast %cst_67 : f32 to vector<8x64xf32>
    %309 = arith.addf %307, %308 : vector<8x64xf32>
    %310 = arith.mulf %303, %288 : vector<8x64xf32>
    %311 = arith.mulf %298, %304 : vector<8x64xf32>
    %312 = arith.addf %310, %311 : vector<8x64xf32>
    %313 = math.tanh %312 : vector<8x64xf32>
    %314 = arith.mulf %309, %313 : vector<8x64xf32>
    %315 = arith.select %73, %314, %287 : vector<8x64xi1>, vector<8x64xf32>
    %316 = arith.select %73, %312, %288 : vector<8x64xi1>, vector<8x64xf32>
    %317 = vector.extract_strided_slice %315 {offsets = [0, 0], sizes = [8, 32], strides = [1, 1]} : vector<8x64xf32> to vector<8x32xf32>
    %318 = vector.extract_strided_slice %315 {offsets = [0, 32], sizes = [8, 32], strides = [1, 1]} : vector<8x64xf32> to vector<8x32xf32>
    %cst_68 = arith.constant dense<0.000000e+00> : vector<8x256xf32>
    %319 = tpu.matmul %315, %80, %cst_68 {dimension_numbers = #tpu.dot_dimension_numbers<[1], [0], [0], [1], [0, 0, 1, 1], [], []>} : vector<8x64xf32>, vector<64x256xf32>, vector<8x256xf32> -> vector<8x256xf32>
    %320 = arith.addf %319, %120 : vector<8x256xf32>
    %321 = math.tanh %320 : vector<8x256xf32>
    %322 = vector.extract_strided_slice %321 {offsets = [0, 0], sizes = [8, 64], strides = [1, 1]} : vector<8x256xf32> to vector<8x64xf32>
    %cst_69 = arith.constant 5.000000e-01 : f32
    %323 = vector.broadcast %cst_69 : f32 to vector<8x64xf32>
    %324 = arith.mulf %323, %322 : vector<8x64xf32>
    %cst_70 = arith.constant 5.000000e-01 : f32
    %325 = vector.broadcast %cst_70 : f32 to vector<8x64xf32>
    %326 = arith.addf %324, %325 : vector<8x64xf32>
    %327 = vector.extract_strided_slice %321 {offsets = [0, 64], sizes = [8, 64], strides = [1, 1]} : vector<8x256xf32> to vector<8x64xf32>
    %cst_71 = arith.constant 5.000000e-01 : f32
    %328 = vector.broadcast %cst_71 : f32 to vector<8x64xf32>
    %329 = arith.mulf %328, %327 : vector<8x64xf32>
    %cst_72 = arith.constant 5.000000e-01 : f32
    %330 = vector.broadcast %cst_72 : f32 to vector<8x64xf32>
    %331 = arith.addf %329, %330 : vector<8x64xf32>
    %332 = vector.extract_strided_slice %321 {offsets = [0, 128], sizes = [8, 64], strides = [1, 1]} : vector<8x256xf32> to vector<8x64xf32>
    %333 = vector.extract_strided_slice %321 {offsets = [0, 192], sizes = [8, 64], strides = [1, 1]} : vector<8x256xf32> to vector<8x64xf32>
    %cst_73 = arith.constant 5.000000e-01 : f32
    %334 = vector.broadcast %cst_73 : f32 to vector<8x64xf32>
    %335 = arith.mulf %334, %333 : vector<8x64xf32>
    %cst_74 = arith.constant 5.000000e-01 : f32
    %336 = vector.broadcast %cst_74 : f32 to vector<8x64xf32>
    %337 = arith.addf %335, %336 : vector<8x64xf32>
    %338 = arith.mulf %331, %316 : vector<8x64xf32>
    %339 = arith.mulf %326, %332 : vector<8x64xf32>
    %340 = arith.addf %338, %339 : vector<8x64xf32>
    %341 = math.tanh %340 : vector<8x64xf32>
    %342 = arith.mulf %337, %341 : vector<8x64xf32>
    %343 = arith.select %78, %342, %315 : vector<8x64xi1>, vector<8x64xf32>
    %344 = vector.extract_strided_slice %343 {offsets = [0, 0], sizes = [8, 32], strides = [1, 1]} : vector<8x64xf32> to vector<8x32xf32>
    %345 = vector.extract_strided_slice %343 {offsets = [0, 32], sizes = [8, 32], strides = [1, 1]} : vector<8x64xf32> to vector<8x32xf32>
    %346 = tpu.concatenate %149, %345 in 1 : vector<8x32xf32>, vector<8x32xf32> -> vector<8x64xf32>
    %347 = tpu.concatenate %177, %318 in 1 : vector<8x32xf32>, vector<8x32xf32> -> vector<8x64xf32>
    %348 = tpu.concatenate %205, %290 in 1 : vector<8x32xf32>, vector<8x32xf32> -> vector<8x64xf32>
    %349 = tpu.concatenate %233, %262 in 1 : vector<8x32xf32>, vector<8x32xf32> -> vector<8x64xf32>
    %350 = tpu.concatenate %261, %234 in 1 : vector<8x32xf32>, vector<8x32xf32> -> vector<8x64xf32>
    %351 = tpu.concatenate %289, %206 in 1 : vector<8x32xf32>, vector<8x32xf32> -> vector<8x64xf32>
    %352 = tpu.concatenate %317, %178 in 1 : vector<8x32xf32>, vector<8x32xf32> -> vector<8x64xf32>
    %353 = tpu.concatenate %344, %150 in 1 : vector<8x32xf32>, vector<8x32xf32> -> vector<8x64xf32>
    %354 = tpu.concatenate %346, %347, %348, %349, %350, %351, %352, %353 in 0 : vector<8x64xf32>, vector<8x64xf32>, vector<8x64xf32>, vector<8x64xf32>, vector<8x64xf32>, vector<8x64xf32>, vector<8x64xf32>, vector<8x64xf32> -> vector<64x64xf32>
    %c0_75 = arith.constant 0 : index
    %c0_76 = arith.constant 0 : index
    %355 = vector.load %arg3[%c0_75, %c0_76] : memref<64x256xf32, #tpu.memory_space<vmem>>, vector<64x256xf32>
    %cst_77 = arith.constant dense<0.000000e+00> : vector<64x256xf32>
    %356 = tpu.matmul %354, %355, %cst_77 {dimension_numbers = #tpu.dot_dimension_numbers<[1], [0], [0], [1], [0, 0, 1, 1], [], []>} : vector<64x64xf32>, vector<64x256xf32>, vector<64x256xf32> -> vector<64x256xf32>
    %c0_78 = arith.constant 0 : index
    %c0_79 = arith.constant 0 : index
    %357 = vector.load %arg5[%c0_78, %c0_79] : memref<1x256xf32, #tpu.memory_space<vmem>>, vector<1x256xf32>
    %358 = vector.broadcast %357 : vector<1x256xf32> to vector<64x256xf32>
    %359 = arith.addf %356, %358 : vector<64x256xf32>
    %c0_80 = arith.constant 0 : index
    %c0_81 = arith.constant 0 : index
    %360 = vector.load %arg4[%c0_80, %c0_81] : memref<64x256xf32, #tpu.memory_space<vmem>>, vector<64x256xf32>
    %361 = vector.extract_strided_slice %359 {offsets = [0, 0], sizes = [8, 256], strides = [1, 1]} : vector<64x256xf32> to vector<8x256xf32>
    %362 = vector.extract_strided_slice %359 {offsets = [56, 0], sizes = [8, 256], strides = [1, 1]} : vector<64x256xf32> to vector<8x256xf32>
    %363 = vector.shape_cast %38 : vector<1x256xi1> to vector<1x256xi1>
    %364 = vector.broadcast %363 : vector<1x256xi1> to vector<8x256xi1>
    %365 = arith.select %364, %361, %362 : vector<8x256xi1>, vector<8x256xf32>
    %366 = vector.extract_strided_slice %359 {offsets = [8, 0], sizes = [8, 256], strides = [1, 1]} : vector<64x256xf32> to vector<8x256xf32>
    %367 = vector.extract_strided_slice %359 {offsets = [48, 0], sizes = [8, 256], strides = [1, 1]} : vector<64x256xf32> to vector<8x256xf32>
    %368 = vector.shape_cast %38 : vector<1x256xi1> to vector<1x256xi1>
    %369 = vector.broadcast %368 : vector<1x256xi1> to vector<8x256xi1>
    %370 = arith.select %369, %366, %367 : vector<8x256xi1>, vector<8x256xf32>
    %371 = vector.extract_strided_slice %359 {offsets = [16, 0], sizes = [8, 256], strides = [1, 1]} : vector<64x256xf32> to vector<8x256xf32>
    %372 = vector.extract_strided_slice %359 {offsets = [40, 0], sizes = [8, 256], strides = [1, 1]} : vector<64x256xf32> to vector<8x256xf32>
    %373 = vector.shape_cast %38 : vector<1x256xi1> to vector<1x256xi1>
    %374 = vector.broadcast %373 : vector<1x256xi1> to vector<8x256xi1>
    %375 = arith.select %374, %371, %372 : vector<8x256xi1>, vector<8x256xf32>
    %376 = vector.extract_strided_slice %359 {offsets = [24, 0], sizes = [8, 256], strides = [1, 1]} : vector<64x256xf32> to vector<8x256xf32>
    %377 = vector.extract_strided_slice %359 {offsets = [32, 0], sizes = [8, 256], strides = [1, 1]} : vector<64x256xf32> to vector<8x256xf32>
    %378 = vector.shape_cast %38 : vector<1x256xi1> to vector<1x256xi1>
    %379 = vector.broadcast %378 : vector<1x256xi1> to vector<8x256xi1>
    %380 = arith.select %379, %376, %377 : vector<8x256xi1>, vector<8x256xf32>
    %381 = vector.extract_strided_slice %359 {offsets = [32, 0], sizes = [8, 256], strides = [1, 1]} : vector<64x256xf32> to vector<8x256xf32>
    %382 = vector.extract_strided_slice %359 {offsets = [24, 0], sizes = [8, 256], strides = [1, 1]} : vector<64x256xf32> to vector<8x256xf32>
    %383 = vector.shape_cast %38 : vector<1x256xi1> to vector<1x256xi1>
    %384 = vector.broadcast %383 : vector<1x256xi1> to vector<8x256xi1>
    %385 = arith.select %384, %381, %382 : vector<8x256xi1>, vector<8x256xf32>
    %386 = vector.extract_strided_slice %359 {offsets = [40, 0], sizes = [8, 256], strides = [1, 1]} : vector<64x256xf32> to vector<8x256xf32>
    %387 = vector.extract_strided_slice %359 {offsets = [16, 0], sizes = [8, 256], strides = [1, 1]} : vector<64x256xf32> to vector<8x256xf32>
    %388 = vector.shape_cast %38 : vector<1x256xi1> to vector<1x256xi1>
    %389 = vector.broadcast %388 : vector<1x256xi1> to vector<8x256xi1>
    %390 = arith.select %389, %386, %387 : vector<8x256xi1>, vector<8x256xf32>
    %391 = vector.extract_strided_slice %359 {offsets = [48, 0], sizes = [8, 256], strides = [1, 1]} : vector<64x256xf32> to vector<8x256xf32>
    %392 = vector.extract_strided_slice %359 {offsets = [8, 0], sizes = [8, 256], strides = [1, 1]} : vector<64x256xf32> to vector<8x256xf32>
    %393 = vector.shape_cast %38 : vector<1x256xi1> to vector<1x256xi1>
    %394 = vector.broadcast %393 : vector<1x256xi1> to vector<8x256xi1>
    %395 = arith.select %394, %391, %392 : vector<8x256xi1>, vector<8x256xf32>
    %396 = vector.extract_strided_slice %359 {offsets = [56, 0], sizes = [8, 256], strides = [1, 1]} : vector<64x256xf32> to vector<8x256xf32>
    %397 = vector.extract_strided_slice %359 {offsets = [0, 0], sizes = [8, 256], strides = [1, 1]} : vector<64x256xf32> to vector<8x256xf32>
    %398 = vector.shape_cast %38 : vector<1x256xi1> to vector<1x256xi1>
    %399 = vector.broadcast %398 : vector<1x256xi1> to vector<8x256xi1>
    %400 = arith.select %399, %396, %397 : vector<8x256xi1>, vector<8x256xf32>
    %cst_82 = arith.constant 0.000000e+00 : f32
    %401 = vector.broadcast %cst_82 : f32 to vector<8x64xf32>
    %cst_83 = arith.constant 0.000000e+00 : f32
    %402 = vector.broadcast %cst_83 : f32 to vector<8x64xf32>
    %cst_84 = arith.constant dense<0.000000e+00> : vector<8x256xf32>
    %403 = tpu.matmul %401, %360, %cst_84 {dimension_numbers = #tpu.dot_dimension_numbers<[1], [0], [0], [1], [0, 0, 1, 1], [], []>} : vector<8x64xf32>, vector<64x256xf32>, vector<8x256xf32> -> vector<8x256xf32>
    %404 = arith.addf %403, %365 : vector<8x256xf32>
    %405 = math.tanh %404 : vector<8x256xf32>
    %406 = vector.extract_strided_slice %405 {offsets = [0, 0], sizes = [8, 64], strides = [1, 1]} : vector<8x256xf32> to vector<8x64xf32>
    %cst_85 = arith.constant 5.000000e-01 : f32
    %407 = vector.broadcast %cst_85 : f32 to vector<8x64xf32>
    %408 = arith.mulf %407, %406 : vector<8x64xf32>
    %cst_86 = arith.constant 5.000000e-01 : f32
    %409 = vector.broadcast %cst_86 : f32 to vector<8x64xf32>
    %410 = arith.addf %408, %409 : vector<8x64xf32>
    %411 = vector.extract_strided_slice %405 {offsets = [0, 64], sizes = [8, 64], strides = [1, 1]} : vector<8x256xf32> to vector<8x64xf32>
    %cst_87 = arith.constant 5.000000e-01 : f32
    %412 = vector.broadcast %cst_87 : f32 to vector<8x64xf32>
    %413 = arith.mulf %412, %411 : vector<8x64xf32>
    %cst_88 = arith.constant 5.000000e-01 : f32
    %414 = vector.broadcast %cst_88 : f32 to vector<8x64xf32>
    %415 = arith.addf %413, %414 : vector<8x64xf32>
    %416 = vector.extract_strided_slice %405 {offsets = [0, 128], sizes = [8, 64], strides = [1, 1]} : vector<8x256xf32> to vector<8x64xf32>
    %417 = vector.extract_strided_slice %405 {offsets = [0, 192], sizes = [8, 64], strides = [1, 1]} : vector<8x256xf32> to vector<8x64xf32>
    %cst_89 = arith.constant 5.000000e-01 : f32
    %418 = vector.broadcast %cst_89 : f32 to vector<8x64xf32>
    %419 = arith.mulf %418, %417 : vector<8x64xf32>
    %cst_90 = arith.constant 5.000000e-01 : f32
    %420 = vector.broadcast %cst_90 : f32 to vector<8x64xf32>
    %421 = arith.addf %419, %420 : vector<8x64xf32>
    %422 = arith.mulf %415, %402 : vector<8x64xf32>
    %423 = arith.mulf %410, %416 : vector<8x64xf32>
    %424 = arith.addf %422, %423 : vector<8x64xf32>
    %425 = math.tanh %424 : vector<8x64xf32>
    %426 = arith.mulf %421, %425 : vector<8x64xf32>
    %427 = arith.select %43, %426, %401 : vector<8x64xi1>, vector<8x64xf32>
    %428 = arith.select %43, %424, %402 : vector<8x64xi1>, vector<8x64xf32>
    %cst_91 = arith.constant dense<0.000000e+00> : vector<8x256xf32>
    %429 = tpu.matmul %427, %360, %cst_91 {dimension_numbers = #tpu.dot_dimension_numbers<[1], [0], [0], [1], [0, 0, 1, 1], [], []>} : vector<8x64xf32>, vector<64x256xf32>, vector<8x256xf32> -> vector<8x256xf32>
    %430 = arith.addf %429, %370 : vector<8x256xf32>
    %431 = math.tanh %430 : vector<8x256xf32>
    %432 = vector.extract_strided_slice %431 {offsets = [0, 0], sizes = [8, 64], strides = [1, 1]} : vector<8x256xf32> to vector<8x64xf32>
    %cst_92 = arith.constant 5.000000e-01 : f32
    %433 = vector.broadcast %cst_92 : f32 to vector<8x64xf32>
    %434 = arith.mulf %433, %432 : vector<8x64xf32>
    %cst_93 = arith.constant 5.000000e-01 : f32
    %435 = vector.broadcast %cst_93 : f32 to vector<8x64xf32>
    %436 = arith.addf %434, %435 : vector<8x64xf32>
    %437 = vector.extract_strided_slice %431 {offsets = [0, 64], sizes = [8, 64], strides = [1, 1]} : vector<8x256xf32> to vector<8x64xf32>
    %cst_94 = arith.constant 5.000000e-01 : f32
    %438 = vector.broadcast %cst_94 : f32 to vector<8x64xf32>
    %439 = arith.mulf %438, %437 : vector<8x64xf32>
    %cst_95 = arith.constant 5.000000e-01 : f32
    %440 = vector.broadcast %cst_95 : f32 to vector<8x64xf32>
    %441 = arith.addf %439, %440 : vector<8x64xf32>
    %442 = vector.extract_strided_slice %431 {offsets = [0, 128], sizes = [8, 64], strides = [1, 1]} : vector<8x256xf32> to vector<8x64xf32>
    %443 = vector.extract_strided_slice %431 {offsets = [0, 192], sizes = [8, 64], strides = [1, 1]} : vector<8x256xf32> to vector<8x64xf32>
    %cst_96 = arith.constant 5.000000e-01 : f32
    %444 = vector.broadcast %cst_96 : f32 to vector<8x64xf32>
    %445 = arith.mulf %444, %443 : vector<8x64xf32>
    %cst_97 = arith.constant 5.000000e-01 : f32
    %446 = vector.broadcast %cst_97 : f32 to vector<8x64xf32>
    %447 = arith.addf %445, %446 : vector<8x64xf32>
    %448 = arith.mulf %441, %428 : vector<8x64xf32>
    %449 = arith.mulf %436, %442 : vector<8x64xf32>
    %450 = arith.addf %448, %449 : vector<8x64xf32>
    %451 = math.tanh %450 : vector<8x64xf32>
    %452 = arith.mulf %447, %451 : vector<8x64xf32>
    %453 = arith.select %48, %452, %427 : vector<8x64xi1>, vector<8x64xf32>
    %454 = arith.select %48, %450, %428 : vector<8x64xi1>, vector<8x64xf32>
    %cst_98 = arith.constant dense<0.000000e+00> : vector<8x256xf32>
    %455 = tpu.matmul %453, %360, %cst_98 {dimension_numbers = #tpu.dot_dimension_numbers<[1], [0], [0], [1], [0, 0, 1, 1], [], []>} : vector<8x64xf32>, vector<64x256xf32>, vector<8x256xf32> -> vector<8x256xf32>
    %456 = arith.addf %455, %375 : vector<8x256xf32>
    %457 = math.tanh %456 : vector<8x256xf32>
    %458 = vector.extract_strided_slice %457 {offsets = [0, 0], sizes = [8, 64], strides = [1, 1]} : vector<8x256xf32> to vector<8x64xf32>
    %cst_99 = arith.constant 5.000000e-01 : f32
    %459 = vector.broadcast %cst_99 : f32 to vector<8x64xf32>
    %460 = arith.mulf %459, %458 : vector<8x64xf32>
    %cst_100 = arith.constant 5.000000e-01 : f32
    %461 = vector.broadcast %cst_100 : f32 to vector<8x64xf32>
    %462 = arith.addf %460, %461 : vector<8x64xf32>
    %463 = vector.extract_strided_slice %457 {offsets = [0, 64], sizes = [8, 64], strides = [1, 1]} : vector<8x256xf32> to vector<8x64xf32>
    %cst_101 = arith.constant 5.000000e-01 : f32
    %464 = vector.broadcast %cst_101 : f32 to vector<8x64xf32>
    %465 = arith.mulf %464, %463 : vector<8x64xf32>
    %cst_102 = arith.constant 5.000000e-01 : f32
    %466 = vector.broadcast %cst_102 : f32 to vector<8x64xf32>
    %467 = arith.addf %465, %466 : vector<8x64xf32>
    %468 = vector.extract_strided_slice %457 {offsets = [0, 128], sizes = [8, 64], strides = [1, 1]} : vector<8x256xf32> to vector<8x64xf32>
    %469 = vector.extract_strided_slice %457 {offsets = [0, 192], sizes = [8, 64], strides = [1, 1]} : vector<8x256xf32> to vector<8x64xf32>
    %cst_103 = arith.constant 5.000000e-01 : f32
    %470 = vector.broadcast %cst_103 : f32 to vector<8x64xf32>
    %471 = arith.mulf %470, %469 : vector<8x64xf32>
    %cst_104 = arith.constant 5.000000e-01 : f32
    %472 = vector.broadcast %cst_104 : f32 to vector<8x64xf32>
    %473 = arith.addf %471, %472 : vector<8x64xf32>
    %474 = arith.mulf %467, %454 : vector<8x64xf32>
    %475 = arith.mulf %462, %468 : vector<8x64xf32>
    %476 = arith.addf %474, %475 : vector<8x64xf32>
    %477 = math.tanh %476 : vector<8x64xf32>
    %478 = arith.mulf %473, %477 : vector<8x64xf32>
    %479 = arith.select %53, %478, %453 : vector<8x64xi1>, vector<8x64xf32>
    %480 = arith.select %53, %476, %454 : vector<8x64xi1>, vector<8x64xf32>
    %cst_105 = arith.constant dense<0.000000e+00> : vector<8x256xf32>
    %481 = tpu.matmul %479, %360, %cst_105 {dimension_numbers = #tpu.dot_dimension_numbers<[1], [0], [0], [1], [0, 0, 1, 1], [], []>} : vector<8x64xf32>, vector<64x256xf32>, vector<8x256xf32> -> vector<8x256xf32>
    %482 = arith.addf %481, %380 : vector<8x256xf32>
    %483 = math.tanh %482 : vector<8x256xf32>
    %484 = vector.extract_strided_slice %483 {offsets = [0, 0], sizes = [8, 64], strides = [1, 1]} : vector<8x256xf32> to vector<8x64xf32>
    %cst_106 = arith.constant 5.000000e-01 : f32
    %485 = vector.broadcast %cst_106 : f32 to vector<8x64xf32>
    %486 = arith.mulf %485, %484 : vector<8x64xf32>
    %cst_107 = arith.constant 5.000000e-01 : f32
    %487 = vector.broadcast %cst_107 : f32 to vector<8x64xf32>
    %488 = arith.addf %486, %487 : vector<8x64xf32>
    %489 = vector.extract_strided_slice %483 {offsets = [0, 64], sizes = [8, 64], strides = [1, 1]} : vector<8x256xf32> to vector<8x64xf32>
    %cst_108 = arith.constant 5.000000e-01 : f32
    %490 = vector.broadcast %cst_108 : f32 to vector<8x64xf32>
    %491 = arith.mulf %490, %489 : vector<8x64xf32>
    %cst_109 = arith.constant 5.000000e-01 : f32
    %492 = vector.broadcast %cst_109 : f32 to vector<8x64xf32>
    %493 = arith.addf %491, %492 : vector<8x64xf32>
    %494 = vector.extract_strided_slice %483 {offsets = [0, 128], sizes = [8, 64], strides = [1, 1]} : vector<8x256xf32> to vector<8x64xf32>
    %495 = vector.extract_strided_slice %483 {offsets = [0, 192], sizes = [8, 64], strides = [1, 1]} : vector<8x256xf32> to vector<8x64xf32>
    %cst_110 = arith.constant 5.000000e-01 : f32
    %496 = vector.broadcast %cst_110 : f32 to vector<8x64xf32>
    %497 = arith.mulf %496, %495 : vector<8x64xf32>
    %cst_111 = arith.constant 5.000000e-01 : f32
    %498 = vector.broadcast %cst_111 : f32 to vector<8x64xf32>
    %499 = arith.addf %497, %498 : vector<8x64xf32>
    %500 = arith.mulf %493, %480 : vector<8x64xf32>
    %501 = arith.mulf %488, %494 : vector<8x64xf32>
    %502 = arith.addf %500, %501 : vector<8x64xf32>
    %503 = math.tanh %502 : vector<8x64xf32>
    %504 = arith.mulf %499, %503 : vector<8x64xf32>
    %505 = arith.select %58, %504, %479 : vector<8x64xi1>, vector<8x64xf32>
    %506 = arith.select %58, %502, %480 : vector<8x64xi1>, vector<8x64xf32>
    %cst_112 = arith.constant dense<0.000000e+00> : vector<8x256xf32>
    %507 = tpu.matmul %505, %360, %cst_112 {dimension_numbers = #tpu.dot_dimension_numbers<[1], [0], [0], [1], [0, 0, 1, 1], [], []>} : vector<8x64xf32>, vector<64x256xf32>, vector<8x256xf32> -> vector<8x256xf32>
    %508 = arith.addf %507, %385 : vector<8x256xf32>
    %509 = math.tanh %508 : vector<8x256xf32>
    %510 = vector.extract_strided_slice %509 {offsets = [0, 0], sizes = [8, 64], strides = [1, 1]} : vector<8x256xf32> to vector<8x64xf32>
    %cst_113 = arith.constant 5.000000e-01 : f32
    %511 = vector.broadcast %cst_113 : f32 to vector<8x64xf32>
    %512 = arith.mulf %511, %510 : vector<8x64xf32>
    %cst_114 = arith.constant 5.000000e-01 : f32
    %513 = vector.broadcast %cst_114 : f32 to vector<8x64xf32>
    %514 = arith.addf %512, %513 : vector<8x64xf32>
    %515 = vector.extract_strided_slice %509 {offsets = [0, 64], sizes = [8, 64], strides = [1, 1]} : vector<8x256xf32> to vector<8x64xf32>
    %cst_115 = arith.constant 5.000000e-01 : f32
    %516 = vector.broadcast %cst_115 : f32 to vector<8x64xf32>
    %517 = arith.mulf %516, %515 : vector<8x64xf32>
    %cst_116 = arith.constant 5.000000e-01 : f32
    %518 = vector.broadcast %cst_116 : f32 to vector<8x64xf32>
    %519 = arith.addf %517, %518 : vector<8x64xf32>
    %520 = vector.extract_strided_slice %509 {offsets = [0, 128], sizes = [8, 64], strides = [1, 1]} : vector<8x256xf32> to vector<8x64xf32>
    %521 = vector.extract_strided_slice %509 {offsets = [0, 192], sizes = [8, 64], strides = [1, 1]} : vector<8x256xf32> to vector<8x64xf32>
    %cst_117 = arith.constant 5.000000e-01 : f32
    %522 = vector.broadcast %cst_117 : f32 to vector<8x64xf32>
    %523 = arith.mulf %522, %521 : vector<8x64xf32>
    %cst_118 = arith.constant 5.000000e-01 : f32
    %524 = vector.broadcast %cst_118 : f32 to vector<8x64xf32>
    %525 = arith.addf %523, %524 : vector<8x64xf32>
    %526 = arith.mulf %519, %506 : vector<8x64xf32>
    %527 = arith.mulf %514, %520 : vector<8x64xf32>
    %528 = arith.addf %526, %527 : vector<8x64xf32>
    %529 = math.tanh %528 : vector<8x64xf32>
    %530 = arith.mulf %525, %529 : vector<8x64xf32>
    %531 = arith.select %63, %530, %505 : vector<8x64xi1>, vector<8x64xf32>
    %532 = arith.select %63, %528, %506 : vector<8x64xi1>, vector<8x64xf32>
    %cst_119 = arith.constant dense<0.000000e+00> : vector<8x256xf32>
    %533 = tpu.matmul %531, %360, %cst_119 {dimension_numbers = #tpu.dot_dimension_numbers<[1], [0], [0], [1], [0, 0, 1, 1], [], []>} : vector<8x64xf32>, vector<64x256xf32>, vector<8x256xf32> -> vector<8x256xf32>
    %534 = arith.addf %533, %390 : vector<8x256xf32>
    %535 = math.tanh %534 : vector<8x256xf32>
    %536 = vector.extract_strided_slice %535 {offsets = [0, 0], sizes = [8, 64], strides = [1, 1]} : vector<8x256xf32> to vector<8x64xf32>
    %cst_120 = arith.constant 5.000000e-01 : f32
    %537 = vector.broadcast %cst_120 : f32 to vector<8x64xf32>
    %538 = arith.mulf %537, %536 : vector<8x64xf32>
    %cst_121 = arith.constant 5.000000e-01 : f32
    %539 = vector.broadcast %cst_121 : f32 to vector<8x64xf32>
    %540 = arith.addf %538, %539 : vector<8x64xf32>
    %541 = vector.extract_strided_slice %535 {offsets = [0, 64], sizes = [8, 64], strides = [1, 1]} : vector<8x256xf32> to vector<8x64xf32>
    %cst_122 = arith.constant 5.000000e-01 : f32
    %542 = vector.broadcast %cst_122 : f32 to vector<8x64xf32>
    %543 = arith.mulf %542, %541 : vector<8x64xf32>
    %cst_123 = arith.constant 5.000000e-01 : f32
    %544 = vector.broadcast %cst_123 : f32 to vector<8x64xf32>
    %545 = arith.addf %543, %544 : vector<8x64xf32>
    %546 = vector.extract_strided_slice %535 {offsets = [0, 128], sizes = [8, 64], strides = [1, 1]} : vector<8x256xf32> to vector<8x64xf32>
    %547 = vector.extract_strided_slice %535 {offsets = [0, 192], sizes = [8, 64], strides = [1, 1]} : vector<8x256xf32> to vector<8x64xf32>
    %cst_124 = arith.constant 5.000000e-01 : f32
    %548 = vector.broadcast %cst_124 : f32 to vector<8x64xf32>
    %549 = arith.mulf %548, %547 : vector<8x64xf32>
    %cst_125 = arith.constant 5.000000e-01 : f32
    %550 = vector.broadcast %cst_125 : f32 to vector<8x64xf32>
    %551 = arith.addf %549, %550 : vector<8x64xf32>
    %552 = arith.mulf %545, %532 : vector<8x64xf32>
    %553 = arith.mulf %540, %546 : vector<8x64xf32>
    %554 = arith.addf %552, %553 : vector<8x64xf32>
    %555 = math.tanh %554 : vector<8x64xf32>
    %556 = arith.mulf %551, %555 : vector<8x64xf32>
    %557 = arith.select %68, %556, %531 : vector<8x64xi1>, vector<8x64xf32>
    %558 = arith.select %68, %554, %532 : vector<8x64xi1>, vector<8x64xf32>
    %cst_126 = arith.constant dense<0.000000e+00> : vector<8x256xf32>
    %559 = tpu.matmul %557, %360, %cst_126 {dimension_numbers = #tpu.dot_dimension_numbers<[1], [0], [0], [1], [0, 0, 1, 1], [], []>} : vector<8x64xf32>, vector<64x256xf32>, vector<8x256xf32> -> vector<8x256xf32>
    %560 = arith.addf %559, %395 : vector<8x256xf32>
    %561 = math.tanh %560 : vector<8x256xf32>
    %562 = vector.extract_strided_slice %561 {offsets = [0, 0], sizes = [8, 64], strides = [1, 1]} : vector<8x256xf32> to vector<8x64xf32>
    %cst_127 = arith.constant 5.000000e-01 : f32
    %563 = vector.broadcast %cst_127 : f32 to vector<8x64xf32>
    %564 = arith.mulf %563, %562 : vector<8x64xf32>
    %cst_128 = arith.constant 5.000000e-01 : f32
    %565 = vector.broadcast %cst_128 : f32 to vector<8x64xf32>
    %566 = arith.addf %564, %565 : vector<8x64xf32>
    %567 = vector.extract_strided_slice %561 {offsets = [0, 64], sizes = [8, 64], strides = [1, 1]} : vector<8x256xf32> to vector<8x64xf32>
    %cst_129 = arith.constant 5.000000e-01 : f32
    %568 = vector.broadcast %cst_129 : f32 to vector<8x64xf32>
    %569 = arith.mulf %568, %567 : vector<8x64xf32>
    %cst_130 = arith.constant 5.000000e-01 : f32
    %570 = vector.broadcast %cst_130 : f32 to vector<8x64xf32>
    %571 = arith.addf %569, %570 : vector<8x64xf32>
    %572 = vector.extract_strided_slice %561 {offsets = [0, 128], sizes = [8, 64], strides = [1, 1]} : vector<8x256xf32> to vector<8x64xf32>
    %573 = vector.extract_strided_slice %561 {offsets = [0, 192], sizes = [8, 64], strides = [1, 1]} : vector<8x256xf32> to vector<8x64xf32>
    %cst_131 = arith.constant 5.000000e-01 : f32
    %574 = vector.broadcast %cst_131 : f32 to vector<8x64xf32>
    %575 = arith.mulf %574, %573 : vector<8x64xf32>
    %cst_132 = arith.constant 5.000000e-01 : f32
    %576 = vector.broadcast %cst_132 : f32 to vector<8x64xf32>
    %577 = arith.addf %575, %576 : vector<8x64xf32>
    %578 = arith.mulf %571, %558 : vector<8x64xf32>
    %579 = arith.mulf %566, %572 : vector<8x64xf32>
    %580 = arith.addf %578, %579 : vector<8x64xf32>
    %581 = math.tanh %580 : vector<8x64xf32>
    %582 = arith.mulf %577, %581 : vector<8x64xf32>
    %583 = arith.select %73, %582, %557 : vector<8x64xi1>, vector<8x64xf32>
    %584 = arith.select %73, %580, %558 : vector<8x64xi1>, vector<8x64xf32>
    %cst_133 = arith.constant dense<0.000000e+00> : vector<8x256xf32>
    %585 = tpu.matmul %583, %360, %cst_133 {dimension_numbers = #tpu.dot_dimension_numbers<[1], [0], [0], [1], [0, 0, 1, 1], [], []>} : vector<8x64xf32>, vector<64x256xf32>, vector<8x256xf32> -> vector<8x256xf32>
    %586 = arith.addf %585, %400 : vector<8x256xf32>
    %587 = math.tanh %586 : vector<8x256xf32>
    %588 = vector.extract_strided_slice %587 {offsets = [0, 0], sizes = [8, 64], strides = [1, 1]} : vector<8x256xf32> to vector<8x64xf32>
    %cst_134 = arith.constant 5.000000e-01 : f32
    %589 = vector.broadcast %cst_134 : f32 to vector<8x64xf32>
    %590 = arith.mulf %589, %588 : vector<8x64xf32>
    %cst_135 = arith.constant 5.000000e-01 : f32
    %591 = vector.broadcast %cst_135 : f32 to vector<8x64xf32>
    %592 = arith.addf %590, %591 : vector<8x64xf32>
    %593 = vector.extract_strided_slice %587 {offsets = [0, 64], sizes = [8, 64], strides = [1, 1]} : vector<8x256xf32> to vector<8x64xf32>
    %cst_136 = arith.constant 5.000000e-01 : f32
    %594 = vector.broadcast %cst_136 : f32 to vector<8x64xf32>
    %595 = arith.mulf %594, %593 : vector<8x64xf32>
    %cst_137 = arith.constant 5.000000e-01 : f32
    %596 = vector.broadcast %cst_137 : f32 to vector<8x64xf32>
    %597 = arith.addf %595, %596 : vector<8x64xf32>
    %598 = vector.extract_strided_slice %587 {offsets = [0, 128], sizes = [8, 64], strides = [1, 1]} : vector<8x256xf32> to vector<8x64xf32>
    %599 = vector.extract_strided_slice %587 {offsets = [0, 192], sizes = [8, 64], strides = [1, 1]} : vector<8x256xf32> to vector<8x64xf32>
    %cst_138 = arith.constant 5.000000e-01 : f32
    %600 = vector.broadcast %cst_138 : f32 to vector<8x64xf32>
    %601 = arith.mulf %600, %599 : vector<8x64xf32>
    %cst_139 = arith.constant 5.000000e-01 : f32
    %602 = vector.broadcast %cst_139 : f32 to vector<8x64xf32>
    %603 = arith.addf %601, %602 : vector<8x64xf32>
    %604 = arith.mulf %597, %584 : vector<8x64xf32>
    %605 = arith.mulf %592, %598 : vector<8x64xf32>
    %606 = arith.addf %604, %605 : vector<8x64xf32>
    %607 = math.tanh %606 : vector<8x64xf32>
    %608 = arith.mulf %603, %607 : vector<8x64xf32>
    %609 = arith.select %78, %608, %583 : vector<8x64xi1>, vector<8x64xf32>
    %c0_140 = arith.constant 0 : index
    %c0_141 = arith.constant 0 : index
    %610 = vector.load %arg6[%c0_140, %c0_141] : memref<64x32xf32, #tpu.memory_space<vmem>>, vector<64x32xf32>
    %cst_142 = arith.constant dense<0.000000e+00> : vector<8x32xf32>
    %611 = tpu.matmul %609, %610, %cst_142 {dimension_numbers = #tpu.dot_dimension_numbers<[1], [0], [0], [1], [0, 0, 1, 1], [], []>} : vector<8x64xf32>, vector<64x32xf32>, vector<8x32xf32> -> vector<8x32xf32>
    %c0_143 = arith.constant 0 : index
    %c0_144 = arith.constant 0 : index
    %612 = vector.load %arg7[%c0_143, %c0_144] : memref<1x32xf32, #tpu.memory_space<vmem>>, vector<1x32xf32>
    %613 = vector.broadcast %612 : vector<1x32xf32> to vector<8x32xf32>
    %614 = arith.addf %611, %613 : vector<8x32xf32>
    %c0_145 = arith.constant 0 : index
    %c0_146 = arith.constant 0 : index
    %615 = vector.load %arg8[%c0_145, %c0_146] : memref<8x32xf32, #tpu.memory_space<vmem>>, vector<8x32xf32>
    tpu.vector_store %arg8[%c0_145, %c0_146], %614 {strides = array<i32>} : memref<8x32xf32, #tpu.memory_space<vmem>>, vector<8x32xf32>,
    return
  }
}

</mosaic_0001>

<bundles_post_ra>
// kernel: mul.7
= control target key start
LH: loop header
LB: loop body
LE: loop exit
PB: predicated region body
PF: predicated region fallthrough
CT: control target
= control target key end

     0   :  { %s34_s0 = inlined_call_operand.vmem [shape: f32[256], index: 0, kind: input, shape index: {}]   ;;  %s35_s1 = inlined_call_operand.vmem [shape: f32[256], index: 1, kind: input, shape index: {}]   ;;  %s36_s2 = inlined_call_operand.vmem [shape: f32[256], index: 2, kind: output, shape index: {}]  }
   0x1   :  { %v3_v0 = vld [vmem:[%s34_s0] sm:$0x3] }
   0x2   :  { %v4_v1 = vld [vmem:[%s35_s1] sm:$0x3] }
   0x3   :  { %v7_v2 = vmul.f32 %v4_v1, %v3_v0 }
   0x5   :  { %9 = vst [vmem:[%s36_s2] sm:$0x3] %v7_v2 }

// kernel: mul.12
= control target key start
LH: loop header
LB: loop body
LE: loop exit
PB: predicated region body
PF: predicated region fallthrough
CT: control target
= control target key end

     0   :  { %s56_s0 = inlined_call_operand.vmem [shape: f32[1,256], index: 0, kind: input, shape index: {}]   ;;  %s57_s1 = inlined_call_operand.vmem [shape: f32[1,256], index: 1, kind: input, shape index: {}]   ;;  %s58_s2 = inlined_call_operand.vmem [shape: f32[1,256], index: 2, kind: output, shape index: {}]  }
   0x1   :  { %v3_v0 = vld [vmem:[%s56_s0] sm:$0x1]  ;;  %v20_v2 = vld [vmem:[%s56_s0 + $0x1] sm:$0x1] }
   0x2   :  { %v4_v1 = vld [vmem:[%s57_s1] sm:$0x1]  ;;  %v21_v4 = vld [vmem:[%s57_s1 + $0x1] sm:$0x1] }
   0x3   :  { %v7_v3 = vmul.f32 %v4_v1, %v3_v0  ;;  %v16_v5 = vmul.f32 %v21_v4, %v20_v2 }
   0x5   :  { %9 = vst [vmem:[%s58_s2] sm:$0x1] %v7_v3  ;;  %22 = vst [vmem:[%s58_s2 + $0x1] sm:$0x1] %v16_v5 }

// kernel: lstm_text_processor.1
= control target key start
LH: loop header
LB: loop body
LE: loop exit
PB: predicated region body
PF: predicated region fallthrough
CT: control target
= control target key end

     0   :  { %13 = vsyncpa [#allocation3], 0  ;;  %s3562_s0 = inlined_call_operand.vmem [shape: s32[8], index: 0, kind: input, shape index: {}]   ;;  %s3563_s1 = inlined_call_operand.vmem [shape: f32[64,256], index: 1, kind: input, shape index: {}]   ;;  %s3564_s2 = inlined_call_operand.vmem [shape: f32[64,256], index: 2, kind: input, shape index: {}]   ;;  %s3565_s3 = inlined_call_operand.vmem [shape: f32[64,256], index: 3, kind: input, shape index: {}]   ;;  %s3566_s4 = inlined_call_operand.vmem [shape: f32[64,256], index: 4, kind: input, shape index: {}]   ;;  %s3567_s5 = inlined_call_operand.vmem [shape: f32[1,256], index: 5, kind: input, shape index: {}]   ;;  %s3568_s6 = inlined_call_operand.vmem [shape: f32[64,32], index: 6, kind: input, shape index: {}]   ;;  %s3569_s7 = inlined_call_operand.vmem [shape: f32[1,32], index: 7, kind: input, shape index: {}]   ;;  %s3570_s8 = inlined_call_operand.vmem [shape: f32[8,32], index: 8, kind: output, shape index: {}]  }
   0x1   :  { %s20_s29 = sshll.u32 %s3562_s0, 4  ;;  %s21_s29 = int_to_ptr.vmem [resolvable:$true] %s20_s29 }
   0x2   :  { %s2550_s30 = scalar_lea.vmem %s21_s29, 16  ;;  %p2555_p1 = scmp.lt.s32.totalorder %s21_s29, %s21_s29 }
   0x3   :  { %p2551_p0 = scmp.ne.s32.totalorder %s21_s29, %s2550_s30  ;;  %p2556_p2 = scmp.lt.s32.totalorder %s2550_s30, %s2550_s30 }
   0x5   :  { %p2557_p3 = por %p2556_p2, %p2555_p1 }
   0x7   :  { %p2558_p4 = pnand %p2557_p3, %p2551_p0 }
   0x9   :  { %2561 = shalt.err (!%p2558_p4)
}
   0xa   :  { %s2564_s9 = smov [#allocation2]  }
   0xb   :  { %23 = dma.vmem_to_smem %s21_s29, 16, %s2564_s9, [#allocation3]  }
   0xc   :  { %2562 = dma.done.wait [#allocation3], 16  }
   0xd   :  { %2563 = vsyncadd [#allocation3], 4294967280 }
   0xe   :  { %41 = sfence }
   0xf   :  { %v135_v0 = vld [vmem:[%s3564_s2 + $0x8] sm:$0xff]  ;;  %v137_v1 = vld [vmem:[%s3564_s2 + $0x18] sm:$0xff]  ;;  %v134_v2 = vld [vmem:[%s3564_s2] sm:$0xff]  ;;  %v2565_v7 = vmov 0.0   ;;  %v72_v25 = vlaneseq  ;;  %s2566_s25 = smov 64   ;;  %s42_s26 = sld [smem:[#allocation2]] }
  0x10   :  { %v2634_v3 = vpack.c.bf16 %v137_v1, %v135_v0  ;;  %v136_v4 = vld [vmem:[%s3564_s2 + $0x10] sm:$0xff]  ;;  %v139_v5 = vld [vmem:[%s3564_s2 + $0x28] sm:$0xff]  ;;  %v141_v6 = vld [vmem:[%s3564_s2 + $0x38] sm:$0xff]  ;;  %238 = vmatprep.mubr.f32.mxu0 %v2565_v7  ;;  %337 = vmatprep.mubr.f32.mxu1 %v2565_v7  ;;  %s2098_s27 = sld [smem:[#allocation2 + $0x1]]  ;;  %s2099_s28 = sld [smem:[#allocation2 + $0x2]]  ;;  %vm58_vm2 = vcmask 1040384  }
  0x11   :  { %v2647_v8 = vpack.c.bf16 %v136_v4, %v134_v2  ;;  %v2649_v9 = vpack.c.bf16 %v141_v6, %v139_v5  ;;  %v138_v10 = vld [vmem:[%s3564_s2 + $0x20] sm:$0xff]  ;;  %v140_v11 = vld [vmem:[%s3564_s2 + $0x30] sm:$0xff]  ;;  %v143_v12 = vld [vmem:[%s3564_s2 + $0x48] sm:$0xff]  ;;  %v2720_v26 = vand.u32 127, %v72_v25  ;;  %s2100_s29 = sld [smem:[#allocation2 + $0x3]]  ;;  %s2101_s30 = sld [smem:[#allocation2 + $0x4]] }
  0x12   :  { %2158 = vmatprep.subr.bf16.mxu0 %v2634_v3  ;;  %v145_v13 = vld [vmem:[%s3564_s2 + $0x58] sm:$0xff]  ;;  %2174 = vmatprep.subr.bf16.mxu1 %v2634_v3  ;;  %v2666_v14 = vpack.c.bf16 %v140_v11, %v138_v10  ;;  %v142_v16 = vld [vmem:[%s3564_s2 + $0x40] sm:$0xff]  ;;  %v144_v17 = vld [vmem:[%s3564_s2 + $0x50] sm:$0xff]  ;;  %vm60_vm3 = vcmask 1041408   ;;  %s2102_s9 = sld [smem:[#allocation2 + $0x5]]  ;;  %vm62_vm4 = vcmask 1042432  }
  0x13   :  { %2160 = vmatpush1.bf16.msra.mxu0 %v2647_v8  ;;  %2176 = vmatpush1.bf16.msra.mxu1 %v2647_v8  ;;  %v2670_v15 = vpack.c.bf16 %v145_v13, %v143_v12  ;;  %v147_v18 = vld [vmem:[%s3564_s2 + $0x68] sm:$0xff]  ;;  %v149_v19 = vld [vmem:[%s3564_s2 + $0x78] sm:$0xff]  ;;  %v2686_v20 = vpack.c.bf16 %v144_v17, %v142_v16  ;;  %v146_v22 = vld [vmem:[%s3564_s2 + $0x60] sm:$0xff]  ;;  %v75_v27 = vadd.s32 128, %v2720_v26  ;;  %v80_v28 = vand.u32 63, %v2720_v26  ;;  %s2103_s10 = sld [smem:[#allocation2 + $0x6]] }
  0x14   :  { %2162 = vmatprep.subr.bf16.mxu0 %v2649_v9  ;;  %2178 = vmatprep.subr.bf16.mxu1 %v2649_v9  ;;  %v2690_v21 = vpack.c.bf16 %v149_v19, %v147_v18  ;;  %v148_v23 = vld [vmem:[%s3564_s2 + $0x70] sm:$0xff]  ;;  %v2731_v31 = vld [vmem:[%s3563_s1] sm:$0xff]  ;;  %v2745_v34 = vld [vmem:[%s3563_s1 + $0x8] sm:$0xff]  ;;  %vm64_vm5 = vcmask 1043456   ;;  %s2104_s11 = sld [smem:[#allocation2 + $0x7]]  ;;  %vm66_vm6 = vcmask 1044480  }
  0x15   :  { %v2700_v24 = vpack.c.bf16 %v148_v23, %v146_v22  ;;  %v87_v29 = vand.u32 63, %v75_v27  ;;  %vm2724_vm0 = vcmp.lt.s32.totalorder %v80_v28, 32  ;;  %v2736_v32 = vld [vmem:[%s3563_s1 + $0x70] sm:$0xff]  ;;  %v2750_v35 = vld [vmem:[%s3563_s1 + $0x78] sm:$0xff]  ;;  %v43_v54 = vstv %s42_s26  ;;  %v2800_v18 = vld [vmem:[%s3563_s1 + $0x60] sm:$0xff] }
  0x16   :  { %v154_v36 = vsel %vm2724_vm0, %v2731_v31, %v2736_v32  ;;  %v45_v55 = vstv %s2098_s27  ;;  %v47_v56 = vstv %s2099_s28  ;;  %vm68_vm7 = vcmask 1045504   ;;  %v2795_v17 = vld [vmem:[%s3563_s1 + $0x10] sm:$0xff]  ;;  %v2805_v19 = vld [vmem:[%s3563_s1 + $0x18] sm:$0xff] }
  0x17   :  { %2164 = vmatpush1.bf16.msra.mxu0 %v2666_v14  ;;  %2180 = vmatpush1.bf16.msra.mxu1 %v2666_v14  ;;  %vm2738_vm1 = vcmp.lt.s32.totalorder %v87_v29, 32  ;;  %v59_v57 = vsel %vm58_vm2, %v43_v54, %v45_v55  ;;  %v49_v58 = vstv %s2100_s29  ;;  %v51_v60 = vstv %s2101_s30  ;;  %v2810_v22 = vld [vmem:[%s3563_s1 + $0x68] sm:$0xff]  ;;  %v2004_v30 = vld [vmem:[%s3568_s6] sm:$0xff] }
  0x18   :  { %2166 = vmatprep.subr.bf16.mxu0 %v2670_v15  ;;  %2182 = vmatprep.subr.bf16.mxu1 %v2670_v15  ;;  %v155_v38 = vsel %vm2738_vm1, %v2745_v34, %v2750_v35  ;;  %v61_v59 = vsel %vm60_vm3, %v59_v57, %v47_v56  ;;  %v53_v62 = vstv %s2102_s9  ;;  %vm70_vm8 = vcmask 1046528   ;;  %v2853_v57 = vld [vmem:[%s3563_s1 + $0x20] sm:$0xff]  ;;  %v2005_v33 = vld [vmem:[%s3568_s6 + $0x8] sm:$0xff] }
  0x19   :  { %v63_v61 = vsel %vm62_vm4, %v61_v59, %v49_v58  ;;  %v55_v0 = vstv %s2103_s10  ;;  %vm74_vm9 = vcmp.lt.s32.totalorder %v2720_v26, 32  ;;  %v2567_v6 = vmov 7   ;;  %v2858_v58 = vld [vmem:[%s3563_s1 + $0x50] sm:$0xff]  ;;  %v2863_v59 = vld [vmem:[%s3563_s1 + $0x28] sm:$0xff] }
  0x1a   :  { %v65_v63 = vsel %vm64_vm5, %v63_v61, %v51_v60  ;;  %v57_v2 = vstv %s2104_s11  ;;  %v2768_v10 = vsel %vm74_vm9, 0, %v2567_v6  ;;  %vm170_vm11 = vcmask 523264   ;;  %v2868_v60 = vld [vmem:[%s3563_s1 + $0x58] sm:$0xff] }
  0x1b   :  { %2168 = vmatpush1.bf16.msra.mxu0 %v2686_v20  ;;  %2184 = vmatpush1.bf16.msra.mxu1 %v2686_v20  ;;  %v67_v1 = vsel %vm66_vm6, %v65_v63, %v53_v62  ;;  %v156_v23 = vsel %vm2724_vm0, %v2795_v17, %v2800_v18  ;;  %v157_v28 = vsel %vm2738_vm1, %v2805_v19, %v2810_v22  ;;  %vm986_vm5 = vcmask 261120  }
  0x1c   :  { %2170 = vmatprep.subr.bf16.mxu0 %v2690_v21  ;;  %2186 = vmatprep.subr.bf16.mxu1 %v2690_v21  ;;  %v69_v4 = vsel %vm68_vm7, %v67_v1, %v55_v0  ;;  %v158_v61 = vsel %vm2724_vm0, %v2853_v57, %v2858_v58  ;;  %v159_v63 = vsel %vm2738_vm1, %v2863_v59, %v2868_v60 }
  0x1d   :  { %v2764_v5 = vsel %vm70_vm8, %v69_v4, %v57_v2 }
  0x1e   :  { %vm103_vm10 = vcmp.gt.s32.totalorder %v2764_v5, %v2768_v10 }
  0x1f   :  { %2172 = vmatpush1.bf16.msra.mxu0 %v2700_v24  ;;  %2188 = vmatpush1.bf16.msra.mxu1 %v2700_v24 }
  0x20   :  { %2190 = vmatprep.subr.bf16.mxu0 %v2634_v3  ;;  %2206 = vmatprep.subr.bf16.mxu1 %v2634_v3 }
  0x22   :  { %239 = vmatmul.mubr.f32.vlgmr.msra.gmra.mrb[0].mxu0 %v2565_v7 }
  0x23   :  { %2192 = vmatpush1.bf16.msra.mxu0 %v2647_v8  ;;  %440 = vmatprep.mubr.f32.mxu0 %v2565_v7 }
  0x24   :  { %2194 = vmatprep.subr.bf16.mxu0 %v2649_v9 }
  0x27   :  { %2196 = vmatpush1.bf16.msra.mxu0 %v2666_v14 }
  0x28   :  { %2198 = vmatprep.subr.bf16.mxu0 %v2670_v15 }
  0x2b   :  { %2200 = vmatpush1.bf16.msra.mxu0 %v2686_v20 }
  0x2c   :  { %2202 = vmatprep.subr.bf16.mxu0 %v2690_v21 }
  0x2f   :  { %2204 = vmatpush1.bf16.msra.mxu0 %v2700_v24 }
  0x30   :  { %2222 = vmatprep.subr.bf16.mxu0 %v2634_v3 }
  0xf5   :  { %v240_v37 = vpop.f32.mrb[0].mxu0 }
  0xf6   :  { %v241_v39 = vadd.f32 %v240_v37, %v154_v36  ;;  %v242_v40 = vpop.f32.mrb[1].mxu0 }
  0xf7   :  { %v243_v41 = vadd.f32 %v242_v40, %v155_v38 }
  0xf8   :  { %2454 = vtanh.f32 %v241_v39 }
  0xf9   :  { %2456 = vtanh.f32 %v243_v41 }
 0x102   :  { %v2455_v42 = vpop.eup %2454 }
 0x103   :  { %v247_v43 = vmul.f32 0.5, %v2455_v42  ;;  %v2457_v45 = vpop.eup %2456 }
 0x104   :  { %v249_v50 = vmul.f32 0.5, %v2457_v45 }
 0x105   :  { %v248_v44 = vadd.f32 0.5, %v247_v43 }
 0x106   :  { %v250_v51 = vadd.f32 0.5, %v249_v50 }
 0x107   :  { %v252_v46 = vmul.f32 %v2457_v45, %v248_v44  ;;  %v251_v47 = vmul.f32 0.0, %v248_v44 }
 0x109   :  { %254 = vrot.lane.b32.xlu0 %v252_v46, %s2566_s25 }
 0x17b   :  { %v255_v48 = vpop.permute.xlu0 %254 }
 0x17c   :  { %v257_v49 = vadd.f32 %v255_v48, %v251_v47 }
 0x17e   :  { %2458 = vtanh.f32 %v257_v49  ;;  %266 = vrot.lane.b32.xlu1 %v257_v49, %s2566_s25 }
 0x188   :  { %v2459_v52 = vpop.eup %2458 }
 0x189   :  { %v259_v53 = vmul.f32 %v2459_v52, %v250_v51  ;;  %v2568_v51 = vmov 6  }
 0x18a   :  { %v2825_v52 = vsel %vm74_vm9, 1, %v2568_v51 }
 0x18b   :  { %261 = vrot.lane.b32.xlu0 %v259_v53, %s2566_s25  ;;  %vm105_vm12 = vcmp.gt.s32.totalorder %v2764_v5, %v2825_v52 }
 0x1f0   :  { %v267_v11 = vpop.permute.xlu1 %266 }
 0x1f1   :  { %v269_v12 = vsel %vm103_vm10, %v267_v11, 0.0 }
 0x1f2   :  { %351 = vrot.lane.b32.xlu1 %v269_v12, %s2566_s25 }
 0x1fd   :  { %v262_v13 = vpop.permute.xlu0 %261 }
 0x1fe   :  { %v2779_v16 = vsel %vm103_vm10, %v262_v13, 0.0 }
 0x1ff   :  { %2105 = vmatmul.mubr.msk.f32.vlgmr.msra.gmra.mrb[0].mxu1 %vm170_vm11, %v2779_v16 }
 0x200   :  { %2208 = vmatpush1.bf16.msra.mxu1 %v2647_v8  ;;  %543 = vmatprep.mubr.f32.mxu1 %v2565_v7 }
 0x201   :  { %2210 = vmatprep.subr.bf16.mxu1 %v2649_v9 }
 0x204   :  { %2212 = vmatpush1.bf16.msra.mxu1 %v2666_v14 }
 0x205   :  { %2214 = vmatprep.subr.bf16.mxu1 %v2670_v15 }
 0x208   :  { %2216 = vmatpush1.bf16.msra.mxu1 %v2686_v20 }
 0x209   :  { %2218 = vmatprep.subr.bf16.mxu1 %v2690_v21 }
 0x20c   :  { %2220 = vmatpush1.bf16.msra.mxu1 %v2700_v24 }
 0x20d   :  { %2238 = vmatprep.subr.bf16.mxu1 %v2634_v3 }
 0x264   :  { %v352_v43 = vpop.permute.xlu1 %351 }
 0x2d2   :  { %v339_v27 = vpop.f32.mrb[0].mxu1 }
 0x2d3   :  { %v340_v29 = vadd.f32 %v339_v27, %v156_v23  ;;  %v341_v36 = vpop.f32.mrb[1].mxu1 }
 0x2d4   :  { %v342_v37 = vadd.f32 %v341_v36, %v157_v28 }
 0x2d5   :  { %2460 = vtanh.f32 %v340_v29 }
 0x2d6   :  { %2462 = vtanh.f32 %v342_v37 }
 0x2df   :  { %v2461_v38 = vpop.eup %2460 }
 0x2e0   :  { %v346_v39 = vmul.f32 0.5, %v2461_v38  ;;  %v2463_v41 = vpop.eup %2462 }
 0x2e1   :  { %v348_v47 = vmul.f32 0.5, %v2463_v41 }
 0x2e2   :  { %v347_v40 = vadd.f32 0.5, %v346_v39 }
 0x2e3   :  { %v349_v48 = vadd.f32 0.5, %v348_v47  ;;  %v126_v47 = vld [vmem:[%s3563_s1 + $0x40] sm:$0xff] }
 0x2e4   :  { %v355_v42 = vmul.f32 %v2463_v41, %v347_v40  ;;  %v354_v44 = vmul.f32 %v352_v43, %v347_v40  ;;  %v2569_v40 = vmov 5  }
 0x2e5   :  { %v2883_v41 = vsel %vm74_vm9, 2, %v2569_v40 }
 0x2e6   :  { %357 = vrot.lane.b32.xlu0 %v355_v42, %s2566_s25  ;;  %vm107_vm13 = vcmp.gt.s32.totalorder %v2764_v5, %v2883_v41 }
 0x358   :  { %v358_v45 = vpop.permute.xlu0 %357 }
 0x359   :  { %v360_v46 = vadd.f32 %v358_v45, %v354_v44 }
 0x35b   :  { %2464 = vtanh.f32 %v360_v46  ;;  %369 = vrot.lane.b32.xlu0 %v360_v46, %s2566_s25  ;;  %v124_v46 = vld [vmem:[%s3563_s1 + $0x30] sm:$0xff] }
 0x35c   :  { %v162_v40 = vsel %vm2724_vm0, %v126_v47, %v124_v46 }
 0x365   :  { %v2465_v49 = vpop.eup %2464 }
 0x366   :  { %v362_v50 = vmul.f32 %v2465_v49, %v349_v48  ;;  %v125_v48 = vld [vmem:[%s3563_s1 + $0x38] sm:$0xff]  ;;  %v127_v49 = vld [vmem:[%s3563_s1 + $0x48] sm:$0xff] }
 0x367   :  { %v161_v51 = vsel %vm2738_vm1, %v125_v48, %v127_v49 }
 0x368   :  { %364 = vrot.lane.b32.xlu1 %v362_v50, %s2566_s25  ;;  %v160_v50 = vsel %vm2724_vm0, %v124_v46, %v126_v47 }
 0x3cd   :  { %v370_v53 = vpop.permute.xlu0 %369 }
 0x3ce   :  { %v372_v54 = vsel %vm105_vm12, %v370_v53, %v269_v12 }
 0x3cf   :  { %454 = vrot.lane.b32.xlu1 %v372_v54, %s2566_s25 }
 0x3da   :  { %v365_v55 = vpop.permute.xlu1 %364 }
 0x3db   :  { %v2837_v56 = vsel %vm105_vm12, %v365_v55, %v2779_v16 }
 0x3dc   :  { %2106 = vmatmul.mubr.msk.f32.vlgmr.msra.gmra.mrb[2].mxu0 %vm170_vm11, %v2837_v56 }
 0x3dd   :  { %2224 = vmatpush1.bf16.msra.mxu0 %v2647_v8  ;;  %646 = vmatprep.mubr.f32.mxu0 %v2565_v7 }
 0x3de   :  { %2226 = vmatprep.subr.bf16.mxu0 %v2649_v9 }
 0x3e1   :  { %2228 = vmatpush1.bf16.msra.mxu0 %v2666_v14 }
 0x3e2   :  { %2230 = vmatprep.subr.bf16.mxu0 %v2670_v15 }
 0x3e5   :  { %2232 = vmatpush1.bf16.msra.mxu0 %v2686_v20 }
 0x3e6   :  { %2234 = vmatprep.subr.bf16.mxu0 %v2690_v21 }
 0x3e9   :  { %2236 = vmatpush1.bf16.msra.mxu0 %v2700_v24 }
 0x3ea   :  { %2254 = vmatprep.subr.bf16.mxu0 %v2634_v3 }
 0x441   :  { %v455_v23 = vpop.permute.xlu1 %454 }
 0x4af   :  { %v442_v62 = vpop.f32.mrb[2].mxu0 }
 0x4b0   :  { %v443_v0 = vadd.f32 %v442_v62, %v158_v61  ;;  %v444_v1 = vpop.f32.mrb[3].mxu0 }
 0x4b1   :  { %v445_v2 = vadd.f32 %v444_v1, %v159_v63 }
 0x4b2   :  { %2466 = vtanh.f32 %v443_v0 }
 0x4b3   :  { %2468 = vtanh.f32 %v445_v2 }
 0x4bc   :  { %v2467_v4 = vpop.eup %2466 }
 0x4bd   :  { %v449_v6 = vmul.f32 0.5, %v2467_v4  ;;  %v2469_v12 = vpop.eup %2468 }
 0x4be   :  { %v451_v36 = vmul.f32 0.5, %v2469_v12 }
 0x4bf   :  { %v450_v11 = vadd.f32 0.5, %v449_v6 }
 0x4c0   :  { %v452_v37 = vadd.f32 0.5, %v451_v36 }
 0x4c1   :  { %v458_v13 = vmul.f32 %v2469_v12, %v450_v11  ;;  %v457_v27 = vmul.f32 %v455_v23, %v450_v11 }
 0x4c3   :  { %460 = vrot.lane.b32.xlu0 %v458_v13, %s2566_s25 }
 0x535   :  { %v461_v28 = vpop.permute.xlu0 %460 }
 0x536   :  { %v463_v29 = vadd.f32 %v461_v28, %v457_v27  ;;  %v2570_v28 = vmov 4  }
 0x538   :  { %2470 = vtanh.f32 %v463_v29  ;;  %472 = vrot.lane.b32.xlu0 %v463_v29, %s2566_s25  ;;  %v2929_v29 = vsel %vm74_vm9, 3, %v2570_v28 }
 0x539   :  { %vm109_vm14 = vcmp.gt.s32.totalorder %v2764_v5, %v2929_v29 }
 0x542   :  { %v2471_v38 = vpop.eup %2470 }
 0x543   :  { %v465_v39 = vmul.f32 %v2471_v38, %v452_v37 }
 0x545   :  { %467 = vrot.lane.b32.xlu1 %v465_v39, %s2566_s25 }
 0x5aa   :  { %v473_v42 = vpop.permute.xlu0 %472 }
 0x5ab   :  { %v475_v43 = vsel %vm107_vm13, %v473_v42, %v372_v54 }
 0x5ac   :  { %557 = vrot.lane.b32.xlu1 %v475_v43, %s2566_s25 }
 0x5b7   :  { %v468_v44 = vpop.permute.xlu1 %467 }
 0x5b8   :  { %v2895_v45 = vsel %vm107_vm13, %v468_v44, %v2837_v56 }
 0x5b9   :  { %2107 = vmatmul.mubr.msk.f32.vlgmr.msra.gmra.mrb[2].mxu1 %vm170_vm11, %v2895_v45 }
 0x5ba   :  { %2240 = vmatpush1.bf16.msra.mxu1 %v2647_v8  ;;  %749 = vmatprep.mubr.f32.mxu1 %v2565_v7 }
 0x5bb   :  { %2242 = vmatprep.subr.bf16.mxu1 %v2649_v9 }
 0x5be   :  { %2244 = vmatpush1.bf16.msra.mxu1 %v2666_v14 }
 0x5bf   :  { %2246 = vmatprep.subr.bf16.mxu1 %v2670_v15 }
 0x5c2   :  { %2248 = vmatpush1.bf16.msra.mxu1 %v2686_v20 }
 0x5c3   :  { %2250 = vmatprep.subr.bf16.mxu1 %v2690_v21 }
 0x5c6   :  { %2252 = vmatpush1.bf16.msra.mxu1 %v2700_v24 }
 0x5c7   :  { %2270 = vmatprep.subr.bf16.mxu1 %v2634_v3 }
 0x61e   :  { %v558_v2 = vpop.permute.xlu1 %557 }
 0x68c   :  { %v545_v3 = vpop.f32.mrb[2].mxu1 }
 0x68d   :  { %v546_v53 = vadd.f32 %v545_v3, %v160_v50  ;;  %v547_v54 = vpop.f32.mrb[3].mxu1 }
 0x68e   :  { %v548_v55 = vadd.f32 %v547_v54, %v161_v51 }
 0x68f   :  { %2472 = vtanh.f32 %v546_v53 }
 0x690   :  { %2474 = vtanh.f32 %v548_v55 }
 0x699   :  { %v2473_v61 = vpop.eup %2472 }
 0x69a   :  { %v552_v62 = vmul.f32 0.5, %v2473_v61  ;;  %v2475_v0 = vpop.eup %2474 }
 0x69b   :  { %v554_v12 = vmul.f32 0.5, %v2475_v0 }
 0x69c   :  { %v553_v63 = vadd.f32 0.5, %v552_v62 }
 0x69d   :  { %v555_v13 = vadd.f32 0.5, %v554_v12 }
 0x69e   :  { %v561_v1 = vmul.f32 %v2475_v0, %v553_v63  ;;  %v560_v4 = vmul.f32 %v558_v2, %v553_v63  ;;  %v2571_v2 = vmov 3  }
 0x6a0   :  { %563 = vrot.lane.b32.xlu0 %v561_v1, %s2566_s25 }
 0x712   :  { %v564_v6 = vpop.permute.xlu0 %563 }
 0x713   :  { %v566_v11 = vadd.f32 %v564_v6, %v560_v4  ;;  %v2962_v4 = vsel %vm74_vm9, 4, %v2571_v2 }
 0x714   :  { %vm111_vm15 = vcmp.gt.s32.totalorder %v2764_v5, %v2962_v4 }
 0x715   :  { %2476 = vtanh.f32 %v566_v11  ;;  %575 = vrot.lane.b32.xlu0 %v566_v11, %s2566_s25 }
 0x71f   :  { %v2477_v23 = vpop.eup %2476 }
 0x720   :  { %v568_v27 = vmul.f32 %v2477_v23, %v555_v13  ;;  %v164_v23 = vsel %vm2724_vm0, %v2858_v58, %v2853_v57 }
 0x722   :  { %570 = vrot.lane.b32.xlu1 %v568_v27, %s2566_s25 }
 0x787   :  { %v576_v36 = vpop.permute.xlu0 %575 }
 0x788   :  { %v578_v37 = vsel %vm109_vm14, %v576_v36, %v475_v43  ;;  %v163_v43 = vsel %vm2738_vm1, %v127_v49, %v125_v48 }
 0x789   :  { %660 = vrot.lane.b32.xlu1 %v578_v37, %s2566_s25 }
 0x794   :  { %v571_v38 = vpop.permute.xlu1 %570 }
 0x795   :  { %v2941_v39 = vsel %vm109_vm14, %v571_v38, %v2895_v45 }
 0x796   :  { %2108 = vmatmul.mubr.msk.f32.vlgmr.msra.gmra.mrb[4].mxu0 %vm170_vm11, %v2941_v39 }
 0x797   :  { %2256 = vmatpush1.bf16.msra.mxu0 %v2647_v8  ;;  %852 = vmatprep.mubr.f32.mxu0 %v2565_v7 }
 0x798   :  { %2258 = vmatprep.subr.bf16.mxu0 %v2649_v9 }
 0x79b   :  { %2260 = vmatpush1.bf16.msra.mxu0 %v2666_v14 }
 0x79c   :  { %2262 = vmatprep.subr.bf16.mxu0 %v2670_v15 }
 0x79f   :  { %2264 = vmatpush1.bf16.msra.mxu0 %v2686_v20 }
 0x7a0   :  { %2266 = vmatprep.subr.bf16.mxu0 %v2690_v21 }
 0x7a3   :  { %2268 = vmatpush1.bf16.msra.mxu0 %v2700_v24 }
 0x7fb   :  { %v661_v62 = vpop.permute.xlu1 %660 }
 0x869   :  { %v648_v42 = vpop.f32.mrb[4].mxu0 }
 0x86a   :  { %v649_v44 = vadd.f32 %v648_v42, %v162_v40  ;;  %v650_v50 = vpop.f32.mrb[5].mxu0 }
 0x86b   :  { %v651_v3 = vadd.f32 %v650_v50, %v163_v43  ;;  %v2572_v43 = vmov 2  }
 0x86c   :  { %2478 = vtanh.f32 %v649_v44  ;;  %v2999_v44 = vsel %vm74_vm9, 5, %v2572_v43  ;;  %v1002_v43 = vld [vmem:[%s3565_s3 + $0x38] sm:$0xff] }
 0x86d   :  { %2480 = vtanh.f32 %v651_v3  ;;  %vm113_vm2 = vcmp.gt.s32.totalorder %v2764_v5, %v2999_v44 }
 0x876   :  { %v2479_v51 = vpop.eup %2478 }
 0x877   :  { %v655_v53 = vmul.f32 0.5, %v2479_v51  ;;  %v2481_v55 = vpop.eup %2480 }
 0x878   :  { %v657_v47 = vmul.f32 0.5, %v2481_v55 }
 0x879   :  { %v656_v54 = vadd.f32 0.5, %v655_v53 }
 0x87a   :  { %v658_v48 = vadd.f32 0.5, %v657_v47 }
 0x87b   :  { %v664_v61 = vmul.f32 %v2481_v55, %v656_v54  ;;  %v663_v63 = vmul.f32 %v661_v62, %v656_v54  ;;  %v166_v54 = vsel %vm2724_vm0, %v2800_v18, %v2795_v17 }
 0x87d   :  { %666 = vrot.lane.b32.xlu0 %v664_v61, %s2566_s25  ;;  %v167_v61 = vsel %vm2738_vm1, %v2810_v22, %v2805_v19 }
 0x8ef   :  { %v667_v0 = vpop.permute.xlu0 %666 }
 0x8f0   :  { %v669_v46 = vadd.f32 %v667_v0, %v663_v63 }
 0x8f2   :  { %2482 = vtanh.f32 %v669_v46  ;;  %678 = vrot.lane.b32.xlu0 %v669_v46, %s2566_s25 }
 0x8fc   :  { %v2483_v49 = vpop.eup %2482 }
 0x8fd   :  { %v671_v1 = vmul.f32 %v2483_v49, %v658_v48 }
 0x8ff   :  { %673 = vrot.lane.b32.xlu1 %v671_v1, %s2566_s25 }
 0x964   :  { %v679_v6 = vpop.permute.xlu0 %678 }
 0x965   :  { %v681_v11 = vsel %vm111_vm15, %v679_v6, %v578_v37 }
 0x966   :  { %763 = vrot.lane.b32.xlu1 %v681_v11, %s2566_s25 }
 0x971   :  { %v674_v12 = vpop.permute.xlu1 %673 }
 0x972   :  { %v2974_v13 = vsel %vm111_vm15, %v674_v12, %v2941_v39 }
 0x973   :  { %2109 = vmatmul.mubr.msk.f32.vlgmr.msra.gmra.mrb[4].mxu1 %vm170_vm11, %v2974_v13 }
 0x974   :  { %2272 = vmatpush1.bf16.msra.mxu1 %v2647_v8  ;;  %955 = vmatprep.mubr.f32.mxu1 %v2565_v7 }
 0x975   :  { %2274 = vmatprep.subr.bf16.mxu1 %v2649_v9  ;;  %v165_v9 = vsel %vm2738_vm1, %v2868_v60, %v2863_v59 }
 0x978   :  { %2276 = vmatpush1.bf16.msra.mxu1 %v2666_v14 }
 0x979   :  { %2278 = vmatprep.subr.bf16.mxu1 %v2670_v15 }
 0x97c   :  { %2280 = vmatpush1.bf16.msra.mxu1 %v2686_v20 }
 0x97d   :  { %2282 = vmatprep.subr.bf16.mxu1 %v2690_v21 }
 0x980   :  { %2284 = vmatpush1.bf16.msra.mxu1 %v2700_v24 }
 0x9d8   :  { %v764_v37 = vpop.permute.xlu1 %763 }
 0xa46   :  { %v751_v8 = vpop.f32.mrb[4].mxu1 }
 0xa47   :  { %v752_v14 = vadd.f32 %v751_v8, %v164_v23  ;;  %v753_v27 = vpop.f32.mrb[5].mxu1  ;;  %v2573_v23 = vmov 1  }
 0xa48   :  { %v754_v15 = vadd.f32 %v753_v27, %v165_v9  ;;  %v3029_v8 = vsel %vm74_vm9, 6, %v2573_v23 }
 0xa49   :  { %2484 = vtanh.f32 %v752_v14  ;;  %vm115_vm3 = vcmp.gt.s32.totalorder %v2764_v5, %v3029_v8 }
 0xa4a   :  { %2486 = vtanh.f32 %v754_v15 }
 0xa53   :  { %v2485_v20 = vpop.eup %2484 }
 0xa54   :  { %v758_v21 = vmul.f32 0.5, %v2485_v20  ;;  %v2487_v24 = vpop.eup %2486  ;;  %v168_v20 = vsel %vm2724_vm0, %v2736_v32, %v2731_v31  ;;  %v996_v31 = vld [vmem:[%s3565_s3 + $0x8] sm:$0xff]  ;;  %v998_v32 = vld [vmem:[%s3565_s3 + $0x18] sm:$0xff] }
 0xa55   :  { %v760_v59 = vmul.f32 0.5, %v2487_v24 }
 0xa56   :  { %v759_v28 = vadd.f32 0.5, %v758_v21 }
 0xa57   :  { %v761_v60 = vadd.f32 0.5, %v760_v59 }
 0xa58   :  { %v767_v36 = vmul.f32 %v2487_v24, %v759_v28  ;;  %v766_v57 = vmul.f32 %v764_v37, %v759_v28  ;;  %v169_v28 = vsel %vm2738_vm1, %v2750_v35, %v2745_v34  ;;  %v995_v34 = vld [vmem:[%s3565_s3] sm:$0xff]  ;;  %v2285_v35 = vpack.c.bf16 %v998_v32, %v996_v31  ;;  %v1169_v31 = vld [vmem:[%s3566_s4 + $0x48] sm:$0xff]  ;;  %v1171_v32 = vld [vmem:[%s3566_s4 + $0x58] sm:$0xff] }
 0xa5a   :  { %769 = vrot.lane.b32.xlu0 %v767_v36, %s2566_s25  ;;  %2286 = vmatprep.subr.bf16.mxu0 %v2285_v35  ;;  %v1168_v35 = vld [vmem:[%s3566_s4 + $0x40] sm:$0xff] }
 0xacc   :  { %v770_v58 = vpop.permute.xlu0 %769 }
 0xacd   :  { %v772_v38 = vadd.f32 %v770_v58, %v766_v57 }
 0xacf   :  { %2488 = vtanh.f32 %v772_v38  ;;  %781 = vrot.lane.b32.xlu0 %v772_v38, %s2566_s25 }
 0xad9   :  { %v2489_v40 = vpop.eup %2488 }
 0xada   :  { %v774_v42 = vmul.f32 %v2489_v40, %v761_v60  ;;  %v997_v40 = vld [vmem:[%s3565_s3 + $0x10] sm:$0xff] }
 0xadc   :  { %776 = vrot.lane.b32.xlu1 %v774_v42, %s2566_s25  ;;  %v1000_v42 = vld [vmem:[%s3565_s3 + $0x28] sm:$0xff] }
 0xb41   :  { %v782_v50 = vpop.permute.xlu0 %781 }
 0xb42   :  { %v784_v3 = vsel %vm113_vm2, %v782_v50, %v681_v11  ;;  %v2287_v50 = vpack.c.bf16 %v997_v40, %v995_v34  ;;  %v3147_v34 = vpack.c.bf16 %v1171_v32, %v1169_v31  ;;  %v1170_v40 = vld [vmem:[%s3566_s4 + $0x50] sm:$0xff] }
 0xb43   :  { %866 = vrot.lane.b32.xlu1 %v784_v3, %s2566_s25 }
 0xb4e   :  { %v777_v51 = vpop.permute.xlu1 %776 }
 0xb4f   :  { %v3011_v53 = vsel %vm113_vm2, %v777_v51, %v2974_v13  ;;  %v999_v51 = vld [vmem:[%s3565_s3 + $0x20] sm:$0xff] }
 0xb50   :  { %2110 = vmatmul.mubr.msk.f32.vlgmr.msra.gmra.mrb[6].mxu0 %vm170_vm11, %v3011_v53 }
 0xb51   :  { %1111 = vmatprep.mubr.f32.mxu0 %v2565_v7  ;;  %2288 = vmatpush1.bf16.msra.mxu0 %v2287_v50  ;;  %v1175_v50 = vld [vmem:[%s3566_s4 + $0x78] sm:$0xff] }
 0xbb5   :  { %v867_v2 = vpop.permute.xlu1 %866 }
 0xc23   :  { %v854_v55 = vpop.f32.mrb[6].mxu0 }
 0xc24   :  { %v855_v62 = vadd.f32 %v854_v55, %v166_v54  ;;  %v856_v63 = vpop.f32.mrb[7].mxu0  ;;  %v1001_v54 = vld [vmem:[%s3565_s3 + $0x30] sm:$0xff]  ;;  %v1004_v55 = vld [vmem:[%s3565_s3 + $0x48] sm:$0xff] }
 0xc25   :  { %v857_v0 = vadd.f32 %v856_v63, %v167_v61  ;;  %v1006_v61 = vld [vmem:[%s3565_s3 + $0x58] sm:$0xff] }
 0xc26   :  { %2490 = vtanh.f32 %v855_v62  ;;  %v2291_v62 = vpack.c.bf16 %v1001_v54, %v999_v51  ;;  %v2293_v63 = vpack.c.bf16 %v1006_v61, %v1004_v55  ;;  %v1172_v51 = vld [vmem:[%s3566_s4 + $0x60] sm:$0xff]  ;;  %v1174_v54 = vld [vmem:[%s3566_s4 + $0x70] sm:$0xff]  ;;  %v2574_v61 = vmov 0  }
 0xc27   :  { %2492 = vtanh.f32 %v857_v0  ;;  %v1003_v0 = vld [vmem:[%s3565_s3 + $0x40] sm:$0xff]  ;;  %v3173_v55 = vpack.c.bf16 %v1174_v54, %v1172_v51 }
 0xc30   :  { %v2491_v46 = vpop.eup %2490 }
 0xc31   :  { %v861_v47 = vmul.f32 0.5, %v2491_v46  ;;  %v2493_v49 = vpop.eup %2492  ;;  %v1005_v46 = vld [vmem:[%s3565_s3 + $0x50] sm:$0xff] }
 0xc32   :  { %v863_v19 = vmul.f32 0.5, %v2493_v49 }
 0xc33   :  { %v862_v48 = vadd.f32 0.5, %v861_v47  ;;  %v1008_v47 = vld [vmem:[%s3565_s3 + $0x68] sm:$0xff] }
 0xc34   :  { %v864_v22 = vadd.f32 0.5, %v863_v19 }
 0xc35   :  { %v870_v1 = vmul.f32 %v2493_v49, %v862_v48  ;;  %v869_v17 = vmul.f32 %v867_v2, %v862_v48  ;;  %v1010_v48 = vld [vmem:[%s3565_s3 + $0x78] sm:$0xff]  ;;  %v2295_v49 = vpack.c.bf16 %v1005_v46, %v1003_v0  ;;  %v1007_v2 = vld [vmem:[%s3565_s3 + $0x60] sm:$0xff] }
 0xc37   :  { %872 = vrot.lane.b32.xlu0 %v870_v1, %s2566_s25  ;;  %v2297_v1 = vpack.c.bf16 %v1010_v48, %v1008_v47  ;;  %v989_v47 = vsel %vm986_vm5, %v2895_v45, %v3011_v53  ;;  %v990_v48 = vsel %vm986_vm5, %v2941_v39, %v2974_v13 }
 0xca9   :  { %v873_v18 = vpop.permute.xlu0 %872 }
 0xcaa   :  { %v875_v6 = vadd.f32 %v873_v18, %v869_v17  ;;  %v1009_v17 = vld [vmem:[%s3565_s3 + $0x70] sm:$0xff] }
 0xcab   :  { %v2299_v18 = vpack.c.bf16 %v1009_v17, %v1007_v2 }
 0xcac   :  { %2494 = vtanh.f32 %v875_v6  ;;  %884 = vrot.lane.b32.xlu0 %v875_v6, %s2566_s25 }
 0xcb6   :  { %v2495_v11 = vpop.eup %2494 }
 0xcb7   :  { %v877_v12 = vmul.f32 %v2495_v11, %v864_v22 }
 0xcb9   :  { %879 = vrot.lane.b32.xlu1 %v877_v12, %s2566_s25 }
 0xd1e   :  { %v885_v9 = vpop.permute.xlu0 %884 }
 0xd1f   :  { %v887_v14 = vsel %vm115_vm3, %v885_v9, %v784_v3  ;;  %v2289_v3 = vpack.c.bf16 %v1002_v43, %v1000_v42  ;;  %v3155_v42 = vpack.c.bf16 %v1170_v40, %v1168_v35  ;;  %v1173_v43 = vld [vmem:[%s3566_s4 + $0x68] sm:$0xff] }
 0xd20   :  { %969 = vrot.lane.b32.xlu1 %v887_v14, %s2566_s25 }
 0xd21   :  { %2290 = vmatprep.subr.bf16.mxu0 %v2289_v3  ;;  %v3165_v3 = vpack.c.bf16 %v1175_v50, %v1173_v43 }
 0xd22   :  { %2292 = vmatpush1.bf16.msra.mxu0 %v2291_v62  ;;  %v3190_v62 = vsel %vm74_vm9, 7, %v2574_v61 }
 0xd23   :  { %2294 = vmatprep.subr.bf16.mxu0 %v2293_v63  ;;  %vm117_vm4 = vcmp.gt.s32.totalorder %v2764_v5, %v3190_v62 }
 0xd26   :  { %2296 = vmatpush1.bf16.msra.mxu0 %v2295_v49  ;;  %v991_v49 = vsel %vm986_vm5, %v2974_v13, %v2941_v39 }
 0xd27   :  { %2298 = vmatprep.subr.bf16.mxu0 %v2297_v1  ;;  %v992_v1 = vsel %vm986_vm5, %v3011_v53, %v2895_v45 }
 0xd2a   :  { %2300 = vmatpush1.bf16.msra.mxu0 %v2299_v18 }
 0xd2b   :  { %v880_v27 = vpop.permute.xlu1 %879 }
 0xd2c   :  { %v3041_v15 = vsel %vm115_vm3, %v880_v27, %v3011_v53  ;;  %v1161_v27 = vld [vmem:[%s3566_s4 + $0x8] sm:$0xff]  ;;  %v1014_v53 = vshrl.u32 %v72_v25, 7 }
 0xd2d   :  { %2111 = vmatmul.mubr.msk.f32.vlgmr.msra.gmra.mrb[6].mxu1 %vm170_vm11, %v3041_v15  ;;  %v988_v26 = vsel %vm986_vm5, %v2837_v56, %v3041_v15  ;;  %v993_v2 = vsel %vm986_vm5, %v3041_v15, %v2837_v56  ;;  %v1011_v56 = vld [vmem:[%s3567_s5] sm:$0x3] }
 0xd2e   :  { %1256 = vmatprep.mubr.f32.mxu1 %v2565_v7  ;;  %v1015_v17 = vsub.s32 0, %v1014_v53  ;;  %v1019_v18 = vsub.s32 1, %v1014_v53 }
 0xd92   :  { %v970_v6 = vpop.permute.xlu1 %969 }
 0xe00   :  { %v957_v21 = vpop.f32.mrb[6].mxu1 }
 0xe01   :  { %v958_v24 = vadd.f32 %v957_v21, %v168_v20  ;;  %v959_v36 = vpop.f32.mrb[7].mxu1  ;;  %v1163_v20 = vld [vmem:[%s3566_s4 + $0x18] sm:$0xff] }
 0xe02   :  { %v960_v37 = vadd.f32 %v959_v36, %v169_v28  ;;  %v3110_v21 = vpack.c.bf16 %v1163_v20, %v1161_v27  ;;  %v1160_v28 = vld [vmem:[%s3566_s4] sm:$0xff] }
 0xe03   :  { %2496 = vtanh.f32 %v958_v24  ;;  %v1162_v24 = vld [vmem:[%s3566_s4 + $0x10] sm:$0xff] }
 0xe04   :  { %2498 = vtanh.f32 %v960_v37  ;;  %v3118_v36 = vpack.c.bf16 %v1162_v24, %v1160_v28  ;;  %2302 = vmatprep.subr.bf16.mxu1 %v3110_v21  ;;  %2334 = vmatprep.subr.bf16.mxu0 %v3110_v21  ;;  %v1165_v37 = vld [vmem:[%s3566_s4 + $0x28] sm:$0xff] }
 0xe06   :  { %2304 = vmatpush1.bf16.msra.mxu1 %v3118_v36 }
 0xe0d   :  { %v2497_v57 = vpop.eup %2496 }
 0xe0e   :  { %v964_v58 = vmul.f32 0.5, %v2497_v57  ;;  %v2499_v59 = vpop.eup %2498  ;;  %v1167_v57 = vld [vmem:[%s3566_s4 + $0x38] sm:$0xff] }
 0xe0f   :  { %v966_v12 = vmul.f32 0.5, %v2499_v59 }
 0xe10   :  { %v965_v38 = vadd.f32 0.5, %v964_v58  ;;  %v3129_v58 = vpack.c.bf16 %v1167_v57, %v1165_v37 }
 0xe11   :  { %v967_v23 = vadd.f32 0.5, %v966_v12 }
 0xe12   :  { %v973_v60 = vmul.f32 %v2499_v59, %v965_v38  ;;  %v972_v19 = vmul.f32 %v970_v6, %v965_v38  ;;  %v1164_v38 = vld [vmem:[%s3566_s4 + $0x20] sm:$0xff]  ;;  %v1166_v59 = vld [vmem:[%s3566_s4 + $0x30] sm:$0xff]  ;;  %2306 = vmatprep.subr.bf16.mxu1 %v3129_v58 }
 0xe14   :  { %975 = vrot.lane.b32.xlu0 %v973_v60, %s2566_s25  ;;  %v3137_v60 = vpack.c.bf16 %v1166_v59, %v1164_v38 }
 0xe16   :  { %2308 = vmatpush1.bf16.msra.mxu1 %v3137_v60 }
 0xe17   :  { %2310 = vmatprep.subr.bf16.mxu1 %v3147_v34 }
 0xe1a   :  { %2312 = vmatpush1.bf16.msra.mxu1 %v3155_v42 }
 0xe1b   :  { %2314 = vmatprep.subr.bf16.mxu1 %v3165_v3 }
 0xe1e   :  { %2316 = vmatpush1.bf16.msra.mxu1 %v3173_v55 }
 0xe1f   :  { %2318 = vmatprep.subr.bf16.mxu1 %v3110_v21 }
 0xe21   :  { %1257 = vmatmul.mubr.f32.vlgmr.msra.gmra.mrb[8].mxu1 %v2565_v7 }
 0xe22   :  { %2320 = vmatpush1.bf16.msra.mxu1 %v3118_v36  ;;  %1355 = vmatprep.mubr.f32.mxu1 %v2565_v7 }
 0xe23   :  { %2322 = vmatprep.subr.bf16.mxu1 %v3129_v58 }
 0xe26   :  { %2324 = vmatpush1.bf16.msra.mxu1 %v3137_v60 }
 0xe27   :  { %2326 = vmatprep.subr.bf16.mxu1 %v3147_v34 }
 0xe2a   :  { %2328 = vmatpush1.bf16.msra.mxu1 %v3155_v42 }
 0xe2b   :  { %2330 = vmatprep.subr.bf16.mxu1 %v3165_v3 }
 0xe2e   :  { %2332 = vmatpush1.bf16.msra.mxu1 %v3173_v55 }
 0xe2f   :  { %2350 = vmatprep.subr.bf16.mxu1 %v3110_v21 }
 0xe86   :  { %v976_v22 = vpop.permute.xlu0 %975 }
 0xe87   :  { %v978_v11 = vadd.f32 %v976_v22, %v972_v19  ;;  %v1016_v19 = vrot.slane %v1011_v56, %v1015_v17  ;;  %v1020_v22 = vrot.slane %v1011_v56, %v1019_v18 }
 0xe89   :  { %2500 = vtanh.f32 %v978_v11 }
 0xe93   :  { %v2501_v9 = vpop.eup %2500 }
 0xe94   :  { %v980_v14 = vmul.f32 %v2501_v9, %v967_v23 }
 0xe96   :  { %982 = vrot.lane.b32.xlu1 %v980_v14, %s2566_s25 }
 0xef4   :  { %v1258_v45 = vpop.f32.mrb[8].mxu1 }
 0xef5   :  { %v1260_v13 = vpop.f32.mrb[9].mxu1 }
 0xf08   :  { %v983_v63 = vpop.permute.xlu1 %982 }
 0xf09   :  { %v985_v0 = vsel %vm117_vm4, %v983_v63, %v3041_v15 }
 0xf0a   :  { %v987_v46 = vsel %vm986_vm5, %v2779_v16, %v985_v0  ;;  %v994_v39 = vsel %vm986_vm5, %v985_v0, %v2779_v16 }
 0xf0b   :  { %2112 = vmatmul.mubr.msk.f32.vlgmr.msra.gmra.mrb[8].mxu0 %vm170_vm11, %v987_v46 }
 0xf0c   :  { %1117 = vmatprep.mubr.f32.mxu0 %v2565_v7  ;;  %2336 = vmatpush1.bf16.msra.mxu0 %v3118_v36 }
 0xf0d   :  { %2338 = vmatprep.subr.bf16.mxu0 %v3129_v58 }
 0xf0f   :  { %2113 = vmatmul.mubr.msk.f32.gmra.mrb[10].mxu0 %vm170_vm11, %v988_v26 }
 0xf10   :  { %1123 = vmatprep.mubr.f32.mxu0 %v2565_v7  ;;  %2340 = vmatpush1.bf16.msra.mxu0 %v3137_v60 }
 0xf11   :  { %2342 = vmatprep.subr.bf16.mxu0 %v3147_v34 }
 0xf13   :  { %2114 = vmatmul.mubr.msk.f32.gmra.mrb[12].mxu0 %vm170_vm11, %v989_v47 }
 0xf14   :  { %1129 = vmatprep.mubr.f32.mxu0 %v2565_v7  ;;  %2344 = vmatpush1.bf16.msra.mxu0 %v3155_v42 }
 0xf15   :  { %2346 = vmatprep.subr.bf16.mxu0 %v3165_v3 }
 0xf17   :  { %2115 = vmatmul.mubr.msk.f32.gmra.mrb[14].mxu0 %vm170_vm11, %v990_v48 }
 0xf18   :  { %1135 = vmatprep.mubr.f32.mxu0 %v2565_v7  ;;  %2348 = vmatpush1.bf16.msra.mxu0 %v3173_v55 }
 0xf19   :  { %2366 = vmatprep.subr.bf16.mxu0 %v3110_v21 }
 0xf1b   :  { %2116 = vmatmul.mubr.msk.f32.gmra.mrb[16].mxu0 %vm170_vm11, %v991_v49 }
 0xf1c   :  { %1141 = vmatprep.mubr.f32.mxu0 %v2565_v7 }
 0xf1f   :  { %2117 = vmatmul.mubr.msk.f32.gmra.mrb[18].mxu0 %vm170_vm11, %v992_v1 }
 0xf20   :  { %1147 = vmatprep.mubr.f32.mxu0 %v2565_v7 }
 0xf23   :  { %2118 = vmatmul.mubr.msk.f32.gmra.mrb[20].mxu0 %vm170_vm11, %v993_v2 }
 0xf24   :  { %1153 = vmatprep.mubr.f32.mxu0 %v2565_v7 }
 0xf27   :  { %2119 = vmatmul.mubr.msk.f32.gmra.mrb[22].mxu0 %vm170_vm11, %v994_v39 }
 0xf28   :  { %1458 = vmatprep.mubr.f32.mxu0 %v2565_v7 }
 0xfde   :  { %v1113_v15 = vpop.f32.mrb[8].mxu0 }
 0xfdf   :  { %v1115_v6 = vpop.f32.mrb[9].mxu0  ;;  %v3320_v18 = vadd.f32 %v1113_v15, %v1016_v19 }
 0xfe2   :  { %v1119_v11 = vpop.f32.mrb[10].mxu0 }
 0xfe3   :  { %v3248_v16 = vadd.f32 %v1119_v11, %v1016_v19  ;;  %v1121_v12 = vpop.f32.mrb[11].mxu0 }
 0xfe4   :  { %v3250_v23 = vadd.f32 %v1121_v12, %v1020_v22 }
 0xfe6   :  { %v1125_v9 = vpop.f32.mrb[12].mxu0 }
 0xfe7   :  { %v3252_v14 = vadd.f32 %v1125_v9, %v1016_v19  ;;  %v1127_v25 = vpop.f32.mrb[13].mxu0  ;;  %v3324_v9 = vadd.f32 %v1115_v6, %v1020_v22 }
 0xfe8   :  { %v3254_v27 = vadd.f32 %v1127_v25, %v1020_v22 }
 0xfea   :  { %v1131_v20 = vpop.f32.mrb[14].mxu0 }
 0xfeb   :  { %v3256_v28 = vadd.f32 %v1131_v20, %v1016_v19  ;;  %v1133_v24 = vpop.f32.mrb[15].mxu0 }
 0xfec   :  { %v3258_v37 = vadd.f32 %v1133_v24, %v1020_v22 }
 0xfee   :  { %v1137_v57 = vpop.f32.mrb[16].mxu0 }
 0xfef   :  { %v3260_v38 = vadd.f32 %v1137_v57, %v1016_v19  ;;  %v1139_v59 = vpop.f32.mrb[17].mxu0 }
 0xff0   :  { %v3262_v31 = vadd.f32 %v1139_v59, %v1020_v22 }
 0xff1   :  { %v1182_v32 = vsel %vm2724_vm0, %v3256_v28, %v3260_v38  ;;  %v1184_v35 = vsel %vm2724_vm0, %v3260_v38, %v3256_v28 }
 0xff2   :  { %v1143_v40 = vpop.f32.mrb[18].mxu0  ;;  %v1183_v43 = vsel %vm2738_vm1, %v3258_v37, %v3262_v31  ;;  %v1185_v50 = vsel %vm2738_vm1, %v3262_v31, %v3258_v37 }
 0xff3   :  { %v3280_v51 = vadd.f32 %v1143_v40, %v1016_v19  ;;  %v1145_v54 = vpop.f32.mrb[19].mxu0 }
 0xff4   :  { %v3282_v61 = vadd.f32 %v1145_v54, %v1020_v22 }
 0xff5   :  { %v1180_v63 = vsel %vm2724_vm0, %v3252_v14, %v3280_v51  ;;  %v1186_v0 = vsel %vm2724_vm0, %v3280_v51, %v3252_v14 }
 0xff6   :  { %v1149_v46 = vpop.f32.mrb[20].mxu0  ;;  %v1181_v26 = vsel %vm2738_vm1, %v3254_v27, %v3282_v61  ;;  %v1187_v47 = vsel %vm2738_vm1, %v3282_v61, %v3254_v27 }
 0xff7   :  { %v3300_v48 = vadd.f32 %v1149_v46, %v1016_v19  ;;  %v1151_v49 = vpop.f32.mrb[21].mxu0 }
 0xff8   :  { %v3302_v1 = vadd.f32 %v1151_v49, %v1020_v22 }
 0xff9   :  { %v1178_v2 = vsel %vm2724_vm0, %v3248_v16, %v3300_v48  ;;  %v1188_v39 = vsel %vm2724_vm0, %v3300_v48, %v3248_v16 }
 0xffa   :  { %v1155_v53 = vpop.f32.mrb[22].mxu0  ;;  %v1179_v17 = vsel %vm2738_vm1, %v3250_v23, %v3302_v1  ;;  %v1189_v56 = vsel %vm2738_vm1, %v3302_v1, %v3250_v23 }
 0xffb   :  { %v3322_v11 = vadd.f32 %v1155_v53, %v1016_v19  ;;  %v1157_v12 = vpop.f32.mrb[23].mxu0 }
 0xffc   :  { %v3326_v25 = vadd.f32 %v1157_v12, %v1020_v22 }
 0xffd   :  { %v1176_v20 = vsel %vm2724_vm0, %v3320_v18, %v3322_v11 }
 0xffe   :  { %v1259_v57 = vadd.f32 %v1258_v45, %v1176_v20  ;;  %v1177_v15 = vsel %vm2738_vm1, %v3324_v9, %v3326_v25 }
 0xfff   :  { %v1261_v19 = vadd.f32 %v1260_v13, %v1177_v15 }
0x1000   :  { %2502 = vtanh.f32 %v1259_v57 }
0x1001   :  { %2504 = vtanh.f32 %v1261_v19 }
0x100a   :  { %v2503_v22 = vpop.eup %2502 }
0x100b   :  { %v1265_v59 = vmul.f32 0.5, %v2503_v22  ;;  %v2505_v54 = vpop.eup %2504 }
0x100c   :  { %v1267_v12 = vmul.f32 0.5, %v2505_v54 }
0x100d   :  { %v1266_v40 = vadd.f32 0.5, %v1265_v59 }
0x100e   :  { %v1268_v20 = vadd.f32 0.5, %v1267_v12 }
0x100f   :  { %v1270_v46 = vmul.f32 %v2505_v54, %v1266_v40  ;;  %v1269_v45 = vmul.f32 0.0, %v1266_v40 }
0x1011   :  { %1272 = vrot.lane.b32.xlu0 %v1270_v46, %s2566_s25 }
0x1083   :  { %v1273_v49 = vpop.permute.xlu0 %1272 }
0x1084   :  { %v1275_v53 = vadd.f32 %v1273_v49, %v1269_v45 }
0x1086   :  { %2506 = vtanh.f32 %v1275_v53  ;;  %1284 = vrot.lane.b32.xlu0 %v1275_v53, %s2566_s25 }
0x1090   :  { %v2507_v24 = vpop.eup %2506 }
0x1091   :  { %v1277_v6 = vmul.f32 %v2507_v24, %v1268_v20 }
0x1093   :  { %1279 = vrot.lane.b32.xlu1 %v1277_v6, %s2566_s25 }
0x10f8   :  { %v1285_v13 = vpop.permute.xlu0 %1284 }
0x10f9   :  { %v1287_v57 = vsel %vm103_vm10, %v1285_v13, 0.0 }
0x10fa   :  { %1369 = vrot.lane.b32.xlu1 %v1287_v57, %s2566_s25 }
0x1105   :  { %v1280_v15 = vpop.permute.xlu1 %1279 }
0x1106   :  { %v1282_v19 = vsel %vm103_vm10, %v1280_v15, 0.0 }
0x1107   :  { %2120 = vmatmul.mubr.msk.f32.vlgmr.msra.gmra.mrb[10].mxu1 %vm170_vm11, %v1282_v19 }
0x1108   :  { %2352 = vmatpush1.bf16.msra.mxu1 %v3118_v36  ;;  %1561 = vmatprep.mubr.f32.mxu1 %v2565_v7 }
0x1109   :  { %2354 = vmatprep.subr.bf16.mxu1 %v3129_v58 }
0x110c   :  { %2356 = vmatpush1.bf16.msra.mxu1 %v3137_v60 }
0x110d   :  { %2358 = vmatprep.subr.bf16.mxu1 %v3147_v34 }
0x1110   :  { %2360 = vmatpush1.bf16.msra.mxu1 %v3155_v42 }
0x1111   :  { %2362 = vmatprep.subr.bf16.mxu1 %v3165_v3 }
0x1114   :  { %2364 = vmatpush1.bf16.msra.mxu1 %v3173_v55 }
0x1115   :  { %2382 = vmatprep.subr.bf16.mxu1 %v3110_v21 }
0x116c   :  { %v1370_v49 = vpop.permute.xlu1 %1369 }
0x11da   :  { %v1357_v10 = vpop.f32.mrb[10].mxu1 }
0x11db   :  { %v1358_v24 = vadd.f32 %v1357_v10, %v1178_v2  ;;  %v1359_v6 = vpop.f32.mrb[11].mxu1 }
0x11dc   :  { %v1360_v22 = vadd.f32 %v1359_v6, %v1179_v17 }
0x11dd   :  { %2508 = vtanh.f32 %v1358_v24 }
0x11de   :  { %2510 = vtanh.f32 %v1360_v22 }
0x11e7   :  { %v2509_v59 = vpop.eup %2508 }
0x11e8   :  { %v1364_v40 = vmul.f32 0.5, %v2509_v59  ;;  %v2511_v46 = vpop.eup %2510 }
0x11e9   :  { %v1366_v13 = vmul.f32 0.5, %v2511_v46 }
0x11ea   :  { %v1365_v54 = vadd.f32 0.5, %v1364_v40 }
0x11eb   :  { %v1367_v2 = vadd.f32 0.5, %v1366_v13 }
0x11ec   :  { %v1373_v45 = vmul.f32 %v2511_v46, %v1365_v54  ;;  %v1372_v53 = vmul.f32 %v1370_v49, %v1365_v54 }
0x11ee   :  { %1375 = vrot.lane.b32.xlu0 %v1373_v45, %s2566_s25 }
0x1260   :  { %v1376_v12 = vpop.permute.xlu0 %1375 }
0x1261   :  { %v1378_v20 = vadd.f32 %v1376_v12, %v1372_v53 }
0x1263   :  { %2512 = vtanh.f32 %v1378_v20  ;;  %1387 = vrot.lane.b32.xlu0 %v1378_v20, %s2566_s25 }
0x126d   :  { %v2513_v15 = vpop.eup %2512 }
0x126e   :  { %v1380_v17 = vmul.f32 %v2513_v15, %v1367_v2 }
0x1270   :  { %1382 = vrot.lane.b32.xlu1 %v1380_v17, %s2566_s25 }
0x12d5   :  { %v1388_v10 = vpop.permute.xlu0 %1387 }
0x12d6   :  { %v1390_v24 = vsel %vm105_vm12, %v1388_v10, %v1287_v57 }
0x12d7   :  { %1472 = vrot.lane.b32.xlu1 %v1390_v24, %s2566_s25 }
0x12e2   :  { %v1383_v6 = vpop.permute.xlu1 %1382 }
0x12e3   :  { %v1385_v22 = vsel %vm105_vm12, %v1383_v6, %v1282_v19 }
0x12e4   :  { %2121 = vmatmul.mubr.msk.f32.vlgmr.msra.gmra.mrb[24].mxu0 %vm170_vm11, %v1385_v22 }
0x12e5   :  { %2368 = vmatpush1.bf16.msra.mxu0 %v3118_v36  ;;  %1664 = vmatprep.mubr.f32.mxu0 %v2565_v7 }
0x12e6   :  { %2370 = vmatprep.subr.bf16.mxu0 %v3129_v58 }
0x12e9   :  { %2372 = vmatpush1.bf16.msra.mxu0 %v3137_v60 }
0x12ea   :  { %2374 = vmatprep.subr.bf16.mxu0 %v3147_v34 }
0x12ed   :  { %2376 = vmatpush1.bf16.msra.mxu0 %v3155_v42 }
0x12ee   :  { %2378 = vmatprep.subr.bf16.mxu0 %v3165_v3 }
0x12f1   :  { %2380 = vmatpush1.bf16.msra.mxu0 %v3173_v55 }
0x12f2   :  { %2398 = vmatprep.subr.bf16.mxu0 %v3110_v21 }
0x1349   :  { %v1473_v53 = vpop.permute.xlu1 %1472 }
0x13b7   :  { %v1460_v52 = vpop.f32.mrb[24].mxu0 }
0x13b8   :  { %v1461_v57 = vadd.f32 %v1460_v52, %v1180_v63  ;;  %v1462_v19 = vpop.f32.mrb[25].mxu0 }
0x13b9   :  { %v1463_v59 = vadd.f32 %v1462_v19, %v1181_v26 }
0x13ba   :  { %2514 = vtanh.f32 %v1461_v57 }
0x13bb   :  { %2516 = vtanh.f32 %v1463_v59 }
0x13c4   :  { %v2515_v40 = vpop.eup %2514 }
0x13c5   :  { %v1467_v54 = vmul.f32 0.5, %v2515_v40  ;;  %v2517_v45 = vpop.eup %2516 }
0x13c6   :  { %v1469_v13 = vmul.f32 0.5, %v2517_v45 }
0x13c7   :  { %v1468_v46 = vadd.f32 0.5, %v1467_v54 }
0x13c8   :  { %v1470_v2 = vadd.f32 0.5, %v1469_v13 }
0x13c9   :  { %v1476_v49 = vmul.f32 %v2517_v45, %v1468_v46  ;;  %v1475_v12 = vmul.f32 %v1473_v53, %v1468_v46 }
0x13cb   :  { %1478 = vrot.lane.b32.xlu0 %v1476_v49, %s2566_s25 }
0x143d   :  { %v1479_v20 = vpop.permute.xlu0 %1478 }
0x143e   :  { %v1481_v63 = vadd.f32 %v1479_v20, %v1475_v12 }
0x1440   :  { %2518 = vtanh.f32 %v1481_v63  ;;  %1490 = vrot.lane.b32.xlu0 %v1481_v63, %s2566_s25 }
0x144a   :  { %v2519_v15 = vpop.eup %2518 }
0x144b   :  { %v1483_v26 = vmul.f32 %v2519_v15, %v1470_v2 }
0x144d   :  { %1485 = vrot.lane.b32.xlu1 %v1483_v26, %s2566_s25 }
0x14b2   :  { %v1491_v17 = vpop.permute.xlu0 %1490 }
0x14b3   :  { %v1493_v10 = vsel %vm107_vm13, %v1491_v17, %v1390_v24 }
0x14b4   :  { %1575 = vrot.lane.b32.xlu1 %v1493_v10, %s2566_s25 }
0x14bf   :  { %v1486_v6 = vpop.permute.xlu1 %1485 }
0x14c0   :  { %v1488_v52 = vsel %vm107_vm13, %v1486_v6, %v1385_v22 }
0x14c1   :  { %2122 = vmatmul.mubr.msk.f32.vlgmr.msra.gmra.mrb[12].mxu1 %vm170_vm11, %v1488_v52 }
0x14c2   :  { %2384 = vmatpush1.bf16.msra.mxu1 %v3118_v36  ;;  %1767 = vmatprep.mubr.f32.mxu1 %v2565_v7 }
0x14c3   :  { %2386 = vmatprep.subr.bf16.mxu1 %v3129_v58 }
0x14c6   :  { %2388 = vmatpush1.bf16.msra.mxu1 %v3137_v60 }
0x14c7   :  { %2390 = vmatprep.subr.bf16.mxu1 %v3147_v34 }
0x14ca   :  { %2392 = vmatpush1.bf16.msra.mxu1 %v3155_v42 }
0x14cb   :  { %2394 = vmatprep.subr.bf16.mxu1 %v3165_v3 }
0x14ce   :  { %2396 = vmatpush1.bf16.msra.mxu1 %v3173_v55 }
0x14cf   :  { %2414 = vmatprep.subr.bf16.mxu1 %v3110_v21 }
0x1526   :  { %v1576_v46 = vpop.permute.xlu1 %1575 }
0x1594   :  { %v1563_v41 = vpop.f32.mrb[12].mxu1 }
0x1595   :  { %v1564_v24 = vadd.f32 %v1563_v41, %v1182_v32  ;;  %v1565_v22 = vpop.f32.mrb[13].mxu1 }
0x1596   :  { %v1566_v57 = vadd.f32 %v1565_v22, %v1183_v43 }
0x1597   :  { %2520 = vtanh.f32 %v1564_v24 }
0x1598   :  { %2522 = vtanh.f32 %v1566_v57 }
0x15a1   :  { %v2521_v19 = vpop.eup %2520 }
0x15a2   :  { %v1570_v59 = vmul.f32 0.5, %v2521_v19  ;;  %v2523_v21 = vpop.eup %2522 }
0x15a3   :  { %v1572_v53 = vmul.f32 0.5, %v2523_v21 }
0x15a4   :  { %v1571_v40 = vadd.f32 0.5, %v1570_v59 }
0x15a5   :  { %v1573_v12 = vadd.f32 0.5, %v1572_v53 }
0x15a6   :  { %v1579_v54 = vmul.f32 %v2523_v21, %v1571_v40  ;;  %v1578_v45 = vmul.f32 %v1576_v46, %v1571_v40 }
0x15a8   :  { %1581 = vrot.lane.b32.xlu0 %v1579_v54, %s2566_s25 }
0x161a   :  { %v1582_v49 = vpop.permute.xlu0 %1581 }
0x161b   :  { %v1584_v32 = vadd.f32 %v1582_v49, %v1578_v45 }
0x161d   :  { %2524 = vtanh.f32 %v1584_v32  ;;  %1593 = vrot.lane.b32.xlu0 %v1584_v32, %s2566_s25 }
0x1627   :  { %v2525_v20 = vpop.eup %2524 }
0x1628   :  { %v1586_v43 = vmul.f32 %v2525_v20, %v1573_v12 }
0x162a   :  { %1588 = vrot.lane.b32.xlu1 %v1586_v43, %s2566_s25 }
0x168f   :  { %v1594_v63 = vpop.permute.xlu0 %1593 }
0x1690   :  { %v1596_v13 = vsel %vm109_vm14, %v1594_v63, %v1493_v10 }
0x1691   :  { %1678 = vrot.lane.b32.xlu1 %v1596_v13, %s2566_s25 }
0x169c   :  { %v1589_v2 = vpop.permute.xlu1 %1588 }
0x169d   :  { %v1591_v15 = vsel %vm109_vm14, %v1589_v2, %v1488_v52 }
0x169e   :  { %2123 = vmatmul.mubr.msk.f32.vlgmr.msra.gmra.mrb[26].mxu0 %vm170_vm11, %v1591_v15 }
0x169f   :  { %2400 = vmatpush1.bf16.msra.mxu0 %v3118_v36  ;;  %1870 = vmatprep.mubr.f32.mxu0 %v2565_v7 }
0x16a0   :  { %2402 = vmatprep.subr.bf16.mxu0 %v3129_v58 }
0x16a3   :  { %2404 = vmatpush1.bf16.msra.mxu0 %v3137_v60 }
0x16a4   :  { %2406 = vmatprep.subr.bf16.mxu0 %v3147_v34 }
0x16a7   :  { %2408 = vmatpush1.bf16.msra.mxu0 %v3155_v42 }
0x16a8   :  { %2410 = vmatprep.subr.bf16.mxu0 %v3165_v3 }
0x16ab   :  { %2412 = vmatpush1.bf16.msra.mxu0 %v3173_v55 }
0x1703   :  { %v1679_v57 = vpop.permute.xlu1 %1678 }
0x1771   :  { %v1666_v29 = vpop.f32.mrb[26].mxu0 }
0x1772   :  { %v1667_v26 = vadd.f32 %v1666_v29, %v1184_v35  ;;  %v1668_v17 = vpop.f32.mrb[27].mxu0 }
0x1773   :  { %v1669_v10 = vadd.f32 %v1668_v17, %v1185_v50 }
0x1774   :  { %2526 = vtanh.f32 %v1667_v26 }
0x1775   :  { %2528 = vtanh.f32 %v1669_v10 }
0x177e   :  { %v2527_v6 = vpop.eup %2526 }
0x177f   :  { %v1673_v52 = vmul.f32 0.5, %v2527_v6  ;;  %v2529_v24 = vpop.eup %2528 }
0x1780   :  { %v1675_v35 = vmul.f32 0.5, %v2529_v24 }
0x1781   :  { %v1674_v41 = vadd.f32 0.5, %v1673_v52 }
0x1782   :  { %v1676_v59 = vadd.f32 0.5, %v1675_v35  ;;  %v3576_v35 = vsel %vm2738_vm1, %v3326_v25, %v3324_v9  ;;  %v2430_v9 = vpack.c.bf16 %v2005_v33, %v2004_v30  ;;  %v2007_v25 = vld [vmem:[%s3568_s6 + $0x18] sm:$0xff] }
0x1783   :  { %v1682_v22 = vmul.f32 %v2529_v24, %v1674_v41  ;;  %v1681_v19 = vmul.f32 %v1679_v57, %v1674_v41 }
0x1785   :  { %1684 = vrot.lane.b32.xlu0 %v1682_v22, %s2566_s25 }
0x17f7   :  { %v1685_v28 = vpop.permute.xlu0 %1684 }
0x17f8   :  { %v1687_v38 = vadd.f32 %v1685_v28, %v1681_v19  ;;  %v3575_v19 = vsel %vm2724_vm0, %v3322_v11, %v3320_v18  ;;  %v2006_v18 = vld [vmem:[%s3568_s6 + $0x10] sm:$0xff]  ;;  %v2575_v11 = vmov 0.0|0.0   ;;  %vm2576_vm0 = vmmov 0  }
0x17f9   :  { %2429 = vmatprep.subr.bf16.mxu0 %v2575_v11 }
0x17fa   :  { %2530 = vtanh.f32 %v1687_v38  ;;  %1696 = vrot.lane.b32.xlu0 %v1687_v38, %s2566_s25 }
0x1804   :  { %v2531_v37 = vpop.eup %2530 }
0x1805   :  { %v1689_v31 = vmul.f32 %v2531_v37, %v1676_v59 }
0x1807   :  { %1691 = vrot.lane.b32.xlu1 %v1689_v31, %s2566_s25 }
0x186c   :  { %v1697_v50 = vpop.permute.xlu0 %1696 }
0x186d   :  { %v1699_v40 = vsel %vm111_vm15, %v1697_v50, %v1596_v13 }
0x186e   :  { %1781 = vrot.lane.b32.xlu1 %v1699_v40, %s2566_s25 }
0x1879   :  { %v1692_v21 = vpop.permute.xlu1 %1691 }
0x187a   :  { %v1694_v54 = vsel %vm111_vm15, %v1692_v21, %v1591_v15  ;;  %v2433_v21 = vpack.c.bf16 %v2007_v25, %v2006_v18 }
0x187b   :  { %2124 = vmatmul.mubr.msk.f32.vlgmr.msra.gmra.mrb[14].mxu1 %vm170_vm11, %v1694_v54 }
0x187c   :  { %2416 = vmatpush1.bf16.msra.mxu1 %v3118_v36  ;;  %1973 = vmatprep.mubr.f32.mxu1 %v2565_v7 }
0x187d   :  { %2418 = vmatprep.subr.bf16.mxu1 %v3129_v58 }
0x1880   :  { %2420 = vmatpush1.bf16.msra.mxu1 %v3137_v60 }
0x1881   :  { %2422 = vmatprep.subr.bf16.mxu1 %v3147_v34 }
0x1884   :  { %2424 = vmatpush1.bf16.msra.mxu1 %v3155_v42 }
0x1885   :  { %2426 = vmatprep.subr.bf16.mxu1 %v3165_v3 }
0x1888   :  { %2428 = vmatpush1.bf16.msra.mxu1 %v3173_v55 }
0x18e0   :  { %v1782_v45 = vpop.permute.xlu1 %1781 }
0x194e   :  { %v1769_v4 = vpop.f32.mrb[14].mxu1 }
0x194f   :  { %v1770_v36 = vadd.f32 %v1769_v4, %v1186_v0  ;;  %v1771_v46 = vpop.f32.mrb[15].mxu1  ;;  %v2009_v4 = vld [vmem:[%s3568_s6 + $0x28] sm:$0xff] }
0x1950   :  { %v1772_v58 = vadd.f32 %v1771_v46, %v1187_v47  ;;  %v2010_v46 = vld [vmem:[%s3568_s6 + $0x30] sm:$0xff] }
0x1951   :  { %2532 = vtanh.f32 %v1770_v36 }
0x1952   :  { %2534 = vtanh.f32 %v1772_v58  ;;  %v2011_v58 = vld [vmem:[%s3568_s6 + $0x38] sm:$0xff] }
0x195b   :  { %v2533_v60 = vpop.eup %2532 }
0x195c   :  { %v1776_v34 = vmul.f32 0.5, %v2533_v60  ;;  %v2535_v3 = vpop.eup %2534  ;;  %v2439_v60 = vpack.c.bf16 %v2011_v58, %v2010_v46 }
0x195d   :  { %v1778_v0 = vmul.f32 0.5, %v2535_v3 }
0x195e   :  { %v1777_v42 = vadd.f32 0.5, %v1776_v34 }
0x195f   :  { %v1779_v32 = vadd.f32 0.5, %v1778_v0 }
0x1960   :  { %v1785_v55 = vmul.f32 %v2535_v3, %v1777_v42  ;;  %v1784_v49 = vmul.f32 %v1782_v45, %v1777_v42 }
0x1962   :  { %1787 = vrot.lane.b32.xlu0 %v1785_v55, %s2566_s25 }
0x19d4   :  { %v1788_v14 = vpop.permute.xlu0 %1787 }
0x19d5   :  { %v1790_v51 = vadd.f32 %v1788_v14, %v1784_v49 }
0x19d7   :  { %2536 = vtanh.f32 %v1790_v51  ;;  %1799 = vrot.lane.b32.xlu0 %v1790_v51, %s2566_s25 }
0x19e1   :  { %v2537_v27 = vpop.eup %2536 }
0x19e2   :  { %v1792_v61 = vmul.f32 %v2537_v27, %v1779_v32  ;;  %v2127_v27 = vld [vmem:[%s3569_s7] ss:$0 sm:$0xff] }
0x19e4   :  { %1794 = vrot.lane.b32.xlu1 %v1792_v61, %s2566_s25 }
0x1a49   :  { %v1800_v47 = vpop.permute.xlu0 %1799 }
0x1a4a   :  { %v1802_v53 = vsel %vm113_vm2, %v1800_v47, %v1699_v40 }
0x1a4b   :  { %1884 = vrot.lane.b32.xlu1 %v1802_v53, %s2566_s25 }
0x1a56   :  { %v1795_v12 = vpop.permute.xlu1 %1794 }
0x1a57   :  { %v1797_v20 = vsel %vm113_vm2, %v1795_v12, %v1694_v54  ;;  %v2008_v54 = vld [vmem:[%s3568_s6 + $0x20] sm:$0xff] }
0x1a58   :  { %2125 = vmatmul.mubr.msk.f32.vlgmr.msra.gmra.mrb[28].mxu0 %vm170_vm11, %v1797_v20  ;;  %v2436_v36 = vpack.c.bf16 %v2009_v4, %v2008_v54 }
0x1a59   :  { %2431 = vmatpush3.bf16.msra.mxu0 %v2430_v9  ;;  %2154 = vmatprep.mubr.msk.f32.mxu0 %vm2576_vm0, %v2565_v7 }
0x1a5a   :  { %2432 = vmatprep.subr.bf16.mxu0 %v2575_v11 }
0x1a5d   :  { %2434 = vmatpush3.bf16.msra.mxu0 %v2433_v21 }
0x1a5e   :  { %2435 = vmatprep.subr.bf16.mxu0 %v2575_v11 }
0x1a61   :  { %2437 = vmatpush3.bf16.msra.mxu0 %v2436_v36 }
0x1a62   :  { %2438 = vmatprep.subr.bf16.mxu0 %v2575_v11 }
0x1a65   :  { %2440 = vmatpush3.bf16.msra.mxu0 %v2439_v60 }
0x1abd   :  { %v1885_v10 = vpop.permute.xlu1 %1884 }
0x1b2b   :  { %v1872_v43 = vpop.f32.mrb[28].mxu0 }
0x1b2c   :  { %v1873_v63 = vadd.f32 %v1872_v43, %v1188_v39  ;;  %v1874_v13 = vpop.f32.mrb[29].mxu0 }
0x1b2d   :  { %v1875_v2 = vadd.f32 %v1874_v13, %v1189_v56 }
0x1b2e   :  { %2538 = vtanh.f32 %v1873_v63 }
0x1b2f   :  { %2540 = vtanh.f32 %v1875_v2 }
0x1b38   :  { %v2539_v44 = vpop.eup %2538 }
0x1b39   :  { %v1879_v15 = vmul.f32 0.5, %v2539_v44  ;;  %v2541_v26 = vpop.eup %2540 }
0x1b3a   :  { %v1881_v39 = vmul.f32 0.5, %v2541_v26 }
0x1b3b   :  { %v1880_v29 = vadd.f32 0.5, %v1879_v15 }
0x1b3c   :  { %v1882_v52 = vadd.f32 0.5, %v1881_v39 }
0x1b3d   :  { %v1888_v17 = vmul.f32 %v2541_v26, %v1880_v29  ;;  %v1887_v6 = vmul.f32 %v1885_v10, %v1880_v29 }
0x1b3f   :  { %1890 = vrot.lane.b32.xlu0 %v1888_v17, %s2566_s25 }
0x1bb1   :  { %v1891_v16 = vpop.permute.xlu0 %1890 }
0x1bb2   :  { %v1893_v48 = vadd.f32 %v1891_v16, %v1887_v6 }
0x1bb4   :  { %2542 = vtanh.f32 %v1893_v48  ;;  %1902 = vrot.lane.b32.xlu0 %v1893_v48, %s2566_s25 }
0x1bbe   :  { %v2543_v23 = vpop.eup %2542 }
0x1bbf   :  { %v1895_v1 = vmul.f32 %v2543_v23, %v1882_v52 }
0x1bc1   :  { %1897 = vrot.lane.b32.xlu1 %v1895_v1, %s2566_s25 }
0x1c26   :  { %v1903_v56 = vpop.permute.xlu0 %1902 }
0x1c27   :  { %v1905_v41 = vsel %vm115_vm3, %v1903_v56, %v1802_v53 }
0x1c28   :  { %1987 = vrot.lane.b32.xlu1 %v1905_v41, %s2566_s25 }
0x1c33   :  { %v1898_v24 = vpop.permute.xlu1 %1897 }
0x1c34   :  { %v1900_v22 = vsel %vm115_vm3, %v1898_v24, %v1797_v20 }
0x1c35   :  { %2126 = vmatmul.mubr.msk.f32.vlgmr.msra.gmra.mrb[16].mxu1 %vm170_vm11, %v1900_v22 }
0x1c9a   :  { %v1988_v34 = vpop.permute.xlu1 %1987 }
0x1d08   :  { %v1975_v57 = vpop.f32.mrb[16].mxu1 }
0x1d09   :  { %v1976_v28 = vadd.f32 %v1975_v57, %v3575_v19  ;;  %v1977_v38 = vpop.f32.mrb[17].mxu1 }
0x1d0a   :  { %v1978_v59 = vadd.f32 %v1977_v38, %v3576_v35 }
0x1d0b   :  { %2544 = vtanh.f32 %v1976_v28 }
0x1d0c   :  { %2546 = vtanh.f32 %v1978_v59 }
0x1d15   :  { %v2545_v8 = vpop.eup %2544 }
0x1d16   :  { %v1982_v37 = vmul.f32 0.5, %v2545_v8  ;;  %v2547_v50 = vpop.eup %2546 }
0x1d17   :  { %v1984_v45 = vmul.f32 0.5, %v2547_v50 }
0x1d18   :  { %v1983_v31 = vadd.f32 0.5, %v1982_v37 }
0x1d19   :  { %v1985_v49 = vadd.f32 0.5, %v1984_v45 }
0x1d1a   :  { %v1991_v40 = vmul.f32 %v2547_v50, %v1983_v31  ;;  %v1990_v42 = vmul.f32 %v1988_v34, %v1983_v31 }
0x1d1c   :  { %1993 = vrot.lane.b32.xlu0 %v1991_v40, %s2566_s25 }
0x1d8e   :  { %v1994_v3 = vpop.permute.xlu0 %1993 }
0x1d8f   :  { %v1996_v55 = vadd.f32 %v1994_v3, %v1990_v42 }
0x1d91   :  { %2548 = vtanh.f32 %v1996_v55 }
0x1d9b   :  { %v2549_v14 = vpop.eup %2548 }
0x1d9c   :  { %v1998_v51 = vmul.f32 %v2549_v14, %v1985_v49 }
0x1d9e   :  { %2000 = vrot.lane.b32.xlu1 %v1998_v51, %s2566_s25 }
0x1e10   :  { %v2001_v0 = vpop.permute.xlu1 %2000 }
0x1e11   :  { %v2003_v32 = vsel %vm117_vm4, %v2001_v0, %v1900_v22 }
0x1e12   :  { %2155 = vmatmul.mubr.msk.f32.vlgmr.msra.gmra.mrb[30].mxu0 %vm170_vm11, %v2003_v32 }
0x1ee5   :  { %v2088_v61 = vpop.f32.mrb[30].mxu0 }
0x1ee6   :  { %v2089_v47 = vadd.f32 %v2127_v27, %v2088_v61  ;;  %v2156_v7 = vpop.f32.mrb[31].mxu0 }
0x1ee8   :  { %2092 = vst.msk [vmem:[%s3570_s8] sm:$0xff] %vm986_vm5, %v2089_v47 }
0x1ee9   :  { %2097 = vsyncpa [#allocation3], 1 }

</bundles_post_ra>
